<compile_context>
chip_gen: v7x
topology: tpu7x:2x2x1
jax: 0.10.0
libtpu: 0.0.40
codegen_flags: <defaults>
</compile_context>

<pallas_src>
import math
import functools

import numpy as np
import jax
import jax.numpy as jnp
from jax.experimental import pallas as pl
from jax.experimental.pallas import tpu as pltpu


_VMEM_LIMIT = 48 * 1024 * 1024   # below v7x physical 64 MiB, above default scoped limits
_ROW_TARGET = 1024               # aim for >= this many tokens per grid step (amortize ~0.35us/step)


# ----------------------------------------------------------------------------
# Pallas kernels
# ----------------------------------------------------------------------------

def _window_attention_kernel(num_heads, *refs):
    """Wb windows per grid step.
    x_ref:    (Wb, N, C)        window tokens (f32)
    wqkv_ref: (C, 3C)           qkv weight, bf16
    bqkv_ref: (1, 3C)           cat(q_bias, zeros, v_bias), f32
    scale_ref:(nH,) SMEM        per-head exp(clamped logit_scale)
    bias_ref: (nH, Wbm, N, N)   16*sigmoid(rel_pos_bias) (+ shift mask), f32; Wbm | Wb
    wproj_ref:(C, C) bf16,  bproj_ref:(1, C) f32
    o_ref:    (Wb, N, C)
    """
    (x_ref, wqkv_ref, bqkv_ref, scale_ref, bias_ref, wproj_ref, bproj_ref, o_ref) = refs

    Wb, N, C = x_ref.shape
    nH = num_heads
    hd = C // nH
    Wbm = bias_ref.shape[1]
    r = Wb // Wbm                                              # bias repeats r times over windows

    # qkv projection for all Wb*N tokens at once (MXU-shaped M dim), bf16 in / f32 acc
    x2d = x_ref[...].reshape(Wb * N, C).astype(jnp.bfloat16)
    qkv = jnp.dot(x2d, wqkv_ref[...], preferred_element_type=jnp.float32)
    qkv = qkv + bqkv_ref[...]                                  # (Wb*N, 3C) f32

    acc = None
    for h in range(nH):                                        # static unroll
        qh = qkv[:, h * hd:(h + 1) * hd]
        kh = qkv[:, C + h * hd:C + (h + 1) * hd]
        vh = qkv[:, 2 * C + h * hd:2 * C + (h + 1) * hd]
        # F.normalize(dim=-1, eps=1e-12)  ==  x * rsqrt(max(sum x^2, eps^2))   (EUP rsqrt)
        qn = qh * jax.lax.rsqrt(jnp.maximum(jnp.sum(qh * qh, axis=-1, keepdims=True), 1e-24))
        kn = kh * jax.lax.rsqrt(jnp.maximum(jnp.sum(kh * kh, axis=-1, keepdims=True), 1e-24))
        qn = qn * scale_ref[h]                                 # fold per-head logit scale into q

        q3 = qn.reshape(Wb, N, hd).astype(jnp.bfloat16)
        k3 = kn.reshape(Wb, N, hd).astype(jnp.bfloat16)
        v3 = vh.reshape(Wb, N, hd).astype(jnp.bfloat16)

        attn = jax.lax.dot_general(                            # (Wb, N, N), batched over windows
            q3, k3, (((2,), (2,)), ((0,), (0,))),
            preferred_element_type=jnp.float32)
        # fused rel-pos bias (+ shift mask); Wbm==1 -> broadcast, Wbm==Wb -> exact, else tile
        attn = (attn.reshape(r, Wbm, N, N) + bias_ref[h]).reshape(Wb, N, N)

        # softmax (f32 math; EUP approx reciprocal for the denominator)
        attn = attn - jnp.max(attn, axis=-1, keepdims=True)
        p = jnp.exp(attn)
        p = p * pl.reciprocal(jnp.sum(p, axis=-1, keepdims=True), approx=True)

        oh = jax.lax.dot_general(                              # (Wb, N, hd)
            p.astype(jnp.bfloat16), v3, (((2,), (1,)), ((0,), (0,))),
            preferred_element_type=jnp.float32)

        # K-split of the output projection: concat(heads) @ Wproj == sum_h oh @ Wproj[h*hd:(h+1)*hd]
        # (sublane-aligned row slice of the weight; avoids a lane-misaligned head concat)
        contrib = jnp.dot(oh.reshape(Wb * N, hd).astype(jnp.bfloat16),
                          wproj_ref[h * hd:(h + 1) * hd, :],
                          preferred_element_type=jnp.float32)
        acc = contrib if acc is None else acc + contrib

    out = acc + bproj_ref[...]                                 # (Wb*N, C)
    o_ref[...] = out.reshape(Wb, N, C).astype(o_ref.dtype)     # one full-width store


def _fused_ln_mlp_kernel(x_ref, a_ref, g1_ref, b1_ref, w1_ref, bb1_ref,
                         w2_ref, bb2_ref, g2_ref, b2_ref, o_ref):
    """Fused block tail:
       x1 = x + LN(attn_x) * g1 + b1
       o  = x1 + LN(fc2(gelu(fc1(x1)))) * g2 + b2
    """
    x = x_ref[...]
    a = a_ref[...]
    mu = jnp.mean(a, axis=-1, keepdims=True)
    var = jnp.mean(jnp.square(a - mu), axis=-1, keepdims=True)
    an = (a - mu) * jax.lax.rsqrt(var + 1e-5)
    x1 = x + an * g1_ref[...] + b1_ref[...]

    h = jnp.dot(x1.astype(jnp.bfloat16), w1_ref[...],
                preferred_element_type=jnp.float32) + bb1_ref[...]
    h = jax.nn.gelu(h, approximate=False)      # exact erf-based GELU (nn.GELU default)
    y = jnp.dot(h.astype(jnp.bfloat16), w2_ref[...],
                preferred_element_type=jnp.float32) + bb2_ref[...]

    mu2 = jnp.mean(y, axis=-1, keepdims=True)
    var2 = jnp.mean(jnp.square(y - mu2), axis=-1, keepdims=True)
    yn = (y - mu2) * jax.lax.rsqrt(var2 + 1e-5)
    o_ref[...] = (x1 + yn * g2_ref[...] + b2_ref[...]).astype(o_ref.dtype)


def _patch_merge_kernel(x_ref, w_ref, g_ref, b_ref, o_ref):
    """o = LayerNorm(x @ w) * g + b   (reduction linear has no bias)"""
    x = x_ref[...].astype(jnp.bfloat16)
    y = jnp.dot(x, w_ref[...], preferred_element_type=jnp.float32)
    mu = jnp.mean(y, axis=-1, keepdims=True)
    var = jnp.mean(jnp.square(y - mu), axis=-1, keepdims=True)
    yn = (y - mu) * jax.lax.rsqrt(var + 1e-5)
    o_ref[...] = (yn * g_ref[...] + b_ref[...]).astype(o_ref.dtype)


# ----------------------------------------------------------------------------
# Pallas wrappers
# ----------------------------------------------------------------------------

def _largest_divisor_leq(n, cap):
    cap = int(max(1, min(n, cap)))
    for d in range(cap, 0, -1):
        if n % d == 0:
            return d
    return 1


def _row_tile(T, row_bytes, budget=8 << 20):
    """Largest divisor of T not exceeding min(1024, budget/row_bytes)."""
    cap = int(max(8, min(1024, budget // max(row_bytes, 1))))
    return _largest_divisor_leq(T, cap)


def _choose_window_tiling(total_windows, nWm, N, C, nH):
    """Pick (Wb, Wbm, mb):
       Wb  = windows per grid step (divides total_windows),
       Wbm = window extent of the bias block (Wbm | Wb),
       mb  = number of bias blocks along the window axis (index_map uses i % mb)."""
    tokens_cap = max(1, _ROW_TARGET // max(N, 1))
    vmem_cap = max(1, (4 << 20) // max(N * C * 4, 1))
    cap = min(tokens_cap, vmem_cap)
    if nWm == 1:                                              # non-shifted block
        return _largest_divisor_leq(total_windows, cap), 1, 1
    bias_bytes = nH * nWm * N * N * 4
    if bias_bytes <= (2 << 20) and total_windows % nWm == 0:
        # small bias -> keep it fully resident, batch a multiple of nWm windows per step
        mult = _largest_divisor_leq(total_windows // nWm, max(1, cap // nWm))
        return mult * nWm, nWm, 1
    # large bias -> tile it: Wb divides both nWm and total_windows (contiguous mask slab)
    g = math.gcd(nWm, total_windows)
    wb = _largest_divisor_leq(g, cap)
    return wb, wb, nWm // wb


def window_attention(xw, blk):
    B_, N, C = xw.shape
    bias = blk["attn_bias"]                # (nH, nWm, N, N); nWm == num shift windows, or 1
    nH, nWm = bias.shape[0], bias.shape[1]
    Wb, Wbm, mb = _choose_window_tiling(B_, nWm, N, C, nH)
    assert B_ % Wb == 0 and Wb % Wbm == 0

    in_specs = [
        pl.BlockSpec((Wb, N, C), lambda i: (i, 0, 0)),
        pl.BlockSpec((C, 3 * C), lambda i: (0, 0)),
        pl.BlockSpec((1, 3 * C), lambda i: (0, 0)),
        pl.BlockSpec(memory_space=pltpu.MemorySpace.SMEM),          # per-head scale scalars
        pl.BlockSpec((nH, Wbm, N, N), lambda i, mb=mb: (0, i % mb, 0, 0)),  # fused bias (+mask)
        pl.BlockSpec((C, C), lambda i: (0, 0)),
        pl.BlockSpec((1, C), lambda i: (0, 0)),
    ]
    args = [xw, blk["wqkv"], blk["bqkv"], blk["scale"], bias, blk["wproj"], blk["bproj"]]

    kernel = functools.partial(_window_attention_kernel, nH)

    return pl.pallas_call(
        kernel,
        out_shape=jax.ShapeDtypeStruct((B_, N, C), xw.dtype),
        grid_spec=pltpu.PrefetchScalarGridSpec(
            num_scalar_prefetch=0,
            grid=(B_ // Wb,),
            in_specs=in_specs,
            out_specs=pl.BlockSpec((Wb, N, C), lambda i: (i, 0, 0)),
        ),
        compiler_params=pltpu.CompilerParams(
            dimension_semantics=("parallel",),
            vmem_limit_bytes=_VMEM_LIMIT),
    )(*args)


def fused_ln_mlp(x2d, attn2d, blk):
    T, C = x2d.shape
    Hd = blk["mlp_w1"].shape[1]
    tile = _row_tile(T, row_bytes=4 * (4 * C + 2 * Hd))
    return pl.pallas_call(
        _fused_ln_mlp_kernel,
        out_shape=jax.ShapeDtypeStruct((T, C), x2d.dtype),
        grid=(T // tile,),
        in_specs=[
            pl.BlockSpec((tile, C), lambda i: (i, 0)),
            pl.BlockSpec((tile, C), lambda i: (i, 0)),
            pl.BlockSpec((1, C), lambda i: (0, 0)),
            pl.BlockSpec((1, C), lambda i: (0, 0)),
            pl.BlockSpec((C, Hd), lambda i: (0, 0)),
            pl.BlockSpec((1, Hd), lambda i: (0, 0)),
            pl.BlockSpec((Hd, C), lambda i: (0, 0)),
            pl.BlockSpec((1, C), lambda i: (0, 0)),
            pl.BlockSpec((1, C), lambda i: (0, 0)),
            pl.BlockSpec((1, C), lambda i: (0, 0)),
        ],
        out_specs=pl.BlockSpec((tile, C), lambda i: (i, 0)),
        compiler_params=pltpu.CompilerParams(
            dimension_semantics=("parallel",),
            vmem_limit_bytes=_VMEM_LIMIT),
    )(x2d, attn2d, blk["n1_g"], blk["n1_b"], blk["mlp_w1"], blk["mlp_b1"],
      blk["mlp_w2"], blk["mlp_b2"], blk["n2_g"], blk["n2_b"])


def patch_merging(x, w, g, b):
    B, H, W, D, C = x.shape
    # TODO(synk): the 2x2x2 gather still materializes an (..., 8C) copy in HBM; folding it into
    # the kernel would need strided manual DMA, left in plain JAX for now.
    x = x.reshape(B, H // 2, 2, W // 2, 2, D // 2, 2, C)
    x = jnp.transpose(x, (0, 1, 3, 5, 6, 4, 2, 7))     # matches permute(0,1,3,5,6,4,2,7)
    x = x.reshape(-1, 8 * C)
    T = x.shape[0]
    out_dim = w.shape[1]
    tile = _row_tile(T, row_bytes=4 * (8 * C + 2 * out_dim))
    y = pl.pallas_call(
        _patch_merge_kernel,
        out_shape=jax.ShapeDtypeStruct((T, out_dim), jnp.float32),
        grid=(T // tile,),
        in_specs=[
            pl.BlockSpec((tile, 8 * C), lambda i: (i, 0)),
            pl.BlockSpec((8 * C, out_dim), lambda i: (0, 0)),
            pl.BlockSpec((1, out_dim), lambda i: (0, 0)),
            pl.BlockSpec((1, out_dim), lambda i: (0, 0)),
        ],
        out_specs=pl.BlockSpec((tile, out_dim), lambda i: (i, 0)),
        compiler_params=pltpu.CompilerParams(
            dimension_semantics=("parallel",),
            vmem_limit_bytes=_VMEM_LIMIT),
    )(x, w, g, b)
    return y.reshape(B, H // 2, W // 2, D // 2, out_dim)


# ----------------------------------------------------------------------------
# JAX / numpy glue (window partition, rel-pos tables, masks, param init)
# ----------------------------------------------------------------------------

def window_partition(x, ws):
    B, H, W, D, C = x.shape
    x = x.reshape(B, H // ws[0], ws[0], W // ws[1], ws[1], D // ws[2], ws[2], C)
    x = jnp.transpose(x, (0, 1, 3, 5, 2, 4, 6, 7))
    return x.reshape(-1, ws[0], ws[1], ws[2], C)


def window_reverse(windows, ws, img_size):
    H, W, D = img_size
    C = windows.shape[-1]
    x = windows.reshape(-1, H // ws[0], W // ws[1], D // ws[2], ws[0], ws[1], ws[2], C)
    x = jnp.transpose(x, (0, 1, 4, 2, 5, 3, 6, 7))
    return x.reshape(-1, H, W, D, C)


def _window_partition_np(x, ws):
    B, H, W, D, C = x.shape
    x = x.reshape(B, H // ws[0], ws[0], W // ws[1], ws[1], D // ws[2], ws[2], C)
    x = np.transpose(x, (0, 1, 3, 5, 2, 4, 6, 7))
    return x.reshape(-1, ws[0], ws[1], ws[2], C)


def build_rel_pos_np(window_size):
    """pseudo_3d=False, pretrained_window_size=(0,0,0) path of the reference code."""
    Wh, Ww, Wd = window_size
    rh = np.arange(-(Wh - 1), Wh, dtype=np.float32)
    rw = np.arange(-(Ww - 1), Ww, dtype=np.float32)
    rd = np.arange(-(Wd - 1), Wd, dtype=np.float32)
    table = np.stack(np.meshgrid(rh, rw, rd, indexing="ij"), axis=-1)[None].copy()
    table[..., 0] /= (Wh - 1) or 1
    table[..., 1] /= (Ww - 1) or 1
    table[..., 2] /= (Wd - 1) or 1
    table *= 8.0
    table = np.sign(table) * np.log2(np.abs(table) + 1.0) / math.log2(8)

    coords = np.stack(np.meshgrid(np.arange(Wh), np.arange(Ww), np.arange(Wd), indexing="ij"))
    cf = coords.reshape(3, -1)
    rel = (cf[:, :, None] - cf[:, None, :]).transpose(1, 2, 0).astype(np.int64)
    rel[..., 0] += Wh - 1
    rel[..., 1] += Ww - 1
    rel[..., 2] += Wd - 1
    rel[..., 0] *= (2 * Ww - 1) * (2 * Wd - 1)
    rel[..., 1] *= (2 * Wd - 1)
    index = rel.sum(-1)
    return table.astype(np.float32), index.astype(np.int32)


def build_attn_mask_np(input_resolution, ws, ss):
    H, W, D = input_resolution
    img_mask = np.zeros((1, H, W, D, 1), dtype=np.float32)
    cnt = 0
    for h in (slice(0, -ws[0]), slice(-ws[0], -ss[0]), slice(-ss[0], None)):
        for w in (slice(0, -ws[1]), slice(-ws[1], -ss[1]), slice(-ss[1], None)):
            for d in (slice(0, -ws[2]), slice(-ws[2], -ss[2]), slice(-ss[2], None)):
                img_mask[:, h, w, d, :] = cnt
                cnt += 1
    mw = _window_partition_np(img_mask, ws).reshape(-1, ws[0] * ws[1] * ws[2])
    attn_mask = mw[:, None, :] - mw[:, :, None]
    attn_mask = np.where(attn_mask != 0, np.float32(-100.0), np.float32(0.0))
    return attn_mask  # (num_windows, N, N)


def calc_window_shift(input_resolution, target_ws, target_ss):
    ws = [r if r <= w else w for r, w in zip(input_resolution, target_ws)]
    ss = [0 if r <= w else s for r, w, s in zip(input_resolution, ws, target_ss)]
    return tuple(ws), tuple(ss)


def init_stage_params(key, dim, out_dim, input_resolution, depth, num_heads,
                      window_size, mlp_ratio=4.0, downsample=True):
    std = 0.02
    keys = iter(jax.random.split(key, 8 + depth * 16))
    params = {}
    output_resolution = tuple(i // 2 for i in input_resolution) if downsample else input_resolution

    if downsample:
        params["ds_w"] = (jax.random.normal(next(keys), (8 * dim, out_dim), jnp.float32)
                          * std).astype(jnp.bfloat16)
        params["ds_g"] = jnp.ones((1, out_dim), jnp.float32)
        params["ds_b"] = jnp.zeros((1, out_dim), jnp.float32)
    else:
        assert dim == out_dim

    C = out_dim
    hidden = int(C * mlp_ratio)
    blocks = []
    for i in range(depth):
        target_ss = (0, 0, 0) if i % 2 == 0 else tuple(w // 2 for w in window_size)
        ws, ss = calc_window_shift(output_resolution, window_size, target_ss)
        N = ws[0] * ws[1] * ws[2]

        b = {"window_size": ws, "shift_size": ss}
        b["wqkv"] = (jax.random.normal(next(keys), (C, 3 * C), jnp.float32) * std
                     ).astype(jnp.bfloat16)
        q_bias = jax.random.normal(next(keys), (C,), jnp.float32) * std
        v_bias = jax.random.normal(next(keys), (C,), jnp.float32) * std
        b["bqkv"] = jnp.concatenate([q_bias, jnp.zeros((C,), jnp.float32), v_bias]).reshape(1, 3 * C)

        logit_scale = jnp.log(10.0 * jnp.ones((num_heads,), jnp.float32))
        b["scale"] = jnp.exp(jnp.minimum(logit_scale, math.log(1.0 / 0.01)))  # (nH,) -> SMEM

        # continuous position bias MLP (3 -> 512 -> nH), evaluated once in plain JAX
        cpb_w1 = jax.random.normal(next(keys), (512, 3), jnp.float32) * std
        cpb_b1 = jnp.zeros((512,), jnp.float32)
        cpb_w2 = jax.random.normal(next(keys), (num_heads, 512), jnp.float32) * std
        table_np, index_np = build_rel_pos_np(ws)
        t = jnp.asarray(table_np.reshape(-1, 3))
        hcpb = jnp.maximum(t @ cpb_w1.T + cpb_b1, 0.0)
        bt = hcpb @ cpb_w2.T                                        # (table, nH)
        rpb = bt[jnp.asarray(index_np.reshape(-1))].reshape(N, N, num_heads)
        rpb = 16.0 * jax.nn.sigmoid(jnp.transpose(rpb, (2, 0, 1)))  # (nH, N, N)

        # fuse rel-pos bias and (optional) shift mask into one additive bias: (nH, nWm, N, N)
        if any(ss):
            mask = jnp.asarray(build_attn_mask_np(output_resolution, ws, ss))  # (nW, N, N)
            b["attn_bias"] = rpb[:, None, :, :] + mask[None, :, :, :]
        else:
            b["attn_bias"] = rpb[:, None, :, :]

        b["wproj"] = (jax.random.normal(next(keys), (C, C), jnp.float32) * std
                      ).astype(jnp.bfloat16)
        b["bproj"] = jax.random.normal(next(keys), (1, C), jnp.float32) * std
        b["n1_g"] = jnp.ones((1, C), jnp.float32)
        b["n1_b"] = jnp.zeros((1, C), jnp.float32)
        b["mlp_w1"] = (jax.random.normal(next(keys), (C, hidden), jnp.float32) * std
                       ).astype(jnp.bfloat16)
        b["mlp_b1"] = jnp.zeros((1, hidden), jnp.float32)
        b["mlp_w2"] = (jax.random.normal(next(keys), (hidden, C), jnp.float32) * std
                       ).astype(jnp.bfloat16)
        b["mlp_b2"] = jnp.zeros((1, C), jnp.float32)
        b["n2_g"] = jnp.ones((1, C), jnp.float32)
        b["n2_b"] = jnp.zeros((1, C), jnp.float32)
        blocks.append(b)

    params["blocks"] = blocks
    return params


# ----------------------------------------------------------------------------
# Forward pass
# ----------------------------------------------------------------------------

def block_forward(blk, x):
    B, H, W, D, C = x.shape
    ws, ss = blk["window_size"], blk["shift_size"]
    N = ws[0] * ws[1] * ws[2]
    has_shift = any(ss)

    shifted = jnp.roll(x, (-ss[0], -ss[1], -ss[2]), axis=(1, 2, 3)) if has_shift else x
    xw = window_partition(shifted, ws).reshape(-1, N, C)
    aw = window_attention(xw, blk)
    aw = aw.reshape(-1, ws[0], ws[1], ws[2], C)
    shifted = window_reverse(aw, ws, (H, W, D))
    attn_x = jnp.roll(shifted, ss, axis=(1, 2, 3)) if has_shift else shifted

    # x = x + norm1(attn(x)); x = x + norm2(mlp(x))   (post-norm; LN is per-token so the
    # flattened fused kernel is exact)
    x2 = fused_ln_mlp(x.reshape(-1, C), attn_x.reshape(-1, C), blk)
    return x2.reshape(B, H, W, D, C)


def stage_forward(params, x):
    if "ds_w" in params:
        x = patch_merging(x, params["ds_w"], params["ds_g"], params["ds_b"])
    for blk in params["blocks"]:
        x = block_forward(blk, x)
    return x


# ----------------------------------------------------------------------------
# Main
# ----------------------------------------------------------------------------

if __name__ == "__main__":
    key = jax.random.PRNGKey(0)
    k_x, k_p = jax.random.split(key)

    B = 2
    dim = 16
    out_dim = 32
    input_resolution = (16, 16, 8)       # -> output resolution (8, 8, 4) after downsample
    depth = 2
    num_heads = 2
    window_size = (4, 4, 2)              # window area N = 32; block 1 is shifted (2, 2, 1)

    x = jax.random.normal(k_x, (B,) + input_resolution + (dim,), jnp.float32)
    params = init_stage_params(k_p, dim, out_dim, input_resolution, depth,
                               num_heads, window_size, mlp_ratio=4.0, downsample=True)

    y = stage_forward(params, x)
    y = jax.block_until_ready(y)

    expected_shape = (B, input_resolution[0] // 2, input_resolution[1] // 2,
                      input_resolution[2] // 2, out_dim)
    assert y.shape == expected_shape, (y.shape, expected_shape)
    assert bool(jnp.all(jnp.isfinite(y)))
    print("KERNEL_OK")
</pallas_src>

<mosaic_0001>
module attributes {stable_mosaic.version = 11 : i64} {
  func.func @_patch_merge_kernel(%arg0: i32, %arg1: memref<512x128xf32, #tpu.memory_space<vmem>>, %arg2: memref<128x32xbf16, #tpu.memory_space<vmem>>, %arg3: memref<1x32xf32, #tpu.memory_space<vmem>>, %arg4: memref<1x32xf32, #tpu.memory_space<vmem>>, %arg5: memref<512x32xf32, #tpu.memory_space<vmem>>) attributes {dimension_semantics = [#tpu.dimension_semantics<parallel>], iteration_bounds = array<i64: 1>, scalar_prefetch = 0 : i64, scratch_operands = 0 : i64, tpu.core_type = #tpu.core_type<tc>, window_params = [{transform_indices = @transform_0, window_bounds = array<i64: 512, 128>}, {pipeline_mode = #tpu.pipeline_mode<synchronous>, transform_indices = @transform_1, window_bounds = array<i64: 128, 32>}, {pipeline_mode = #tpu.pipeline_mode<synchronous>, transform_indices = @transform_2, window_bounds = array<i64: 1, 32>}, {pipeline_mode = #tpu.pipeline_mode<synchronous>, transform_indices = @transform_3, window_bounds = array<i64: 1, 32>}, {transform_indices = @transform_4, window_bounds = array<i64: 512, 32>}]} {
    %c0 = arith.constant 0 : index
    %c0_0 = arith.constant 0 : index
    %0 = vector.load %arg1[%c0, %c0_0] : memref<512x128xf32, #tpu.memory_space<vmem>>, vector<512x128xf32>
    %1 = arith.truncf %0 : vector<512x128xf32> to vector<512x128xbf16>
    %c0_1 = arith.constant 0 : index
    %c0_2 = arith.constant 0 : index
    %2 = vector.load %arg2[%c0_1, %c0_2] : memref<128x32xbf16, #tpu.memory_space<vmem>>, vector<128x32xbf16>
    %cst = arith.constant dense<0.000000e+00> : vector<512x32xf32>
    %3 = tpu.matmul %1, %2, %cst {dimension_numbers = #tpu.dot_dimension_numbers<[1], [0], [0], [1], [0, 0, 1, 1], [], []>} : vector<512x128xbf16>, vector<128x32xbf16>, vector<512x32xf32> -> vector<512x32xf32>
    %cst_3 = arith.constant dense<0.000000e+00> : vector<512xf32>
    %4 = vector.multi_reduction <add>, %3, %cst_3 [1] : vector<512x32xf32> to vector<512xf32>
    %5 = vector.shape_cast %4 : vector<512xf32> to vector<512x1xf32>
    %cst_4 = arith.constant 3.200000e+01 : f32
    %6 = vector.broadcast %cst_4 : f32 to vector<512x1xf32>
    %7 = arith.divf %5, %6 : vector<512x1xf32>
    %8 = vector.broadcast %7 : vector<512x1xf32> to vector<512x32xf32>
    %9 = arith.subf %3, %8 : vector<512x32xf32>
    %10 = arith.mulf %9, %9 : vector<512x32xf32>
    %cst_5 = arith.constant dense<0.000000e+00> : vector<512xf32>
    %11 = vector.multi_reduction <add>, %10, %cst_5 [1] : vector<512x32xf32> to vector<512xf32>
    %12 = vector.shape_cast %11 : vector<512xf32> to vector<512x1xf32>
    %cst_6 = arith.constant 3.200000e+01 : f32
    %13 = vector.broadcast %cst_6 : f32 to vector<512x1xf32>
    %14 = arith.divf %12, %13 : vector<512x1xf32>
    %15 = vector.broadcast %7 : vector<512x1xf32> to vector<512x32xf32>
    %16 = arith.subf %3, %15 : vector<512x32xf32>
    %cst_7 = arith.constant 9.99999974E-6 : f32
    %17 = vector.broadcast %cst_7 : f32 to vector<512x1xf32>
    %18 = arith.addf %14, %17 : vector<512x1xf32>
    %19 = math.rsqrt %18 : vector<512x1xf32>
    %20 = vector.broadcast %19 : vector<512x1xf32> to vector<512x32xf32>
    %21 = arith.mulf %16, %20 : vector<512x32xf32>
    %c0_8 = arith.constant 0 : index
    %c0_9 = arith.constant 0 : index
    %22 = vector.load %arg3[%c0_8, %c0_9] : memref<1x32xf32, #tpu.memory_space<vmem>>, vector<1x32xf32>
    %23 = vector.broadcast %22 : vector<1x32xf32> to vector<512x32xf32>
    %24 = arith.mulf %21, %23 : vector<512x32xf32>
    %c0_10 = arith.constant 0 : index
    %c0_11 = arith.constant 0 : index
    %25 = vector.load %arg4[%c0_10, %c0_11] : memref<1x32xf32, #tpu.memory_space<vmem>>, vector<1x32xf32>
    %26 = vector.broadcast %25 : vector<1x32xf32> to vector<512x32xf32>
    %27 = arith.addf %24, %26 : vector<512x32xf32>
    %c0_12 = arith.constant 0 : index
    %c0_13 = arith.constant 0 : index
    %28 = vector.load %arg5[%c0_12, %c0_13] : memref<512x32xf32, #tpu.memory_space<vmem>>, vector<512x32xf32>
    tpu.vector_store %arg5[%c0_12, %c0_13], %27 {strides = array<i32>} : memref<512x32xf32, #tpu.memory_space<vmem>>, vector<512x32xf32>,
    return
  }
  func.func @transform_0(%arg0: i32) -> (i32, i32) {
    %c0_i32 = arith.constant 0 : i32
    %c0_i32_0 = arith.constant 0 : i32
    return %arg0, %c0_i32 : i32, i32
  }
  func.func @transform_1(%arg0: i32) -> (i32, i32) {
    %c0_i32 = arith.constant 0 : i32
    %c0_i32_0 = arith.constant 0 : i32
    %c0_i32_1 = arith.constant 0 : i32
    return %c0_i32, %c0_i32_0 : i32, i32
  }
  func.func @transform_2(%arg0: i32) -> (i32, i32) {
    %c0_i32 = arith.constant 0 : i32
    %c0_i32_0 = arith.constant 0 : i32
    %c0_i32_1 = arith.constant 0 : i32
    return %c0_i32, %c0_i32_0 : i32, i32
  }
  func.func @transform_3(%arg0: i32) -> (i32, i32) {
    %c0_i32 = arith.constant 0 : i32
    %c0_i32_0 = arith.constant 0 : i32
    %c0_i32_1 = arith.constant 0 : i32
    return %c0_i32, %c0_i32_0 : i32, i32
  }
  func.func @transform_4(%arg0: i32) -> (i32, i32) {
    %c0_i32 = arith.constant 0 : i32
    %c0_i32_0 = arith.constant 0 : i32
    return %arg0, %c0_i32 : i32, i32
  }
}

</mosaic_0001>

<bundles_post_ra>
// kernel: tpu_custom_call.1
= control target key start
LH: loop header
LB: loop body
LE: loop exit
PB: predicated region body
PF: predicated region fallthrough
CT: control target
= control target key end

     0   :  { %9 = vsyncpa [#allocation3], 0  ;;  %s1837_s15 = smov [#allocation2]   ;;  %s2991_s0 = inlined_call_operand.hbm [shape: f32[512,128], index: 0, kind: input, shape index: {}]   ;;  %s2992_s1 = inlined_call_operand.vmem [shape: bf16[128,32], index: 1, kind: input, shape index: {}]   ;;  %s2993_s2 = inlined_call_operand.vmem [shape: f32[1,32], index: 2, kind: input, shape index: {}]   ;;  %s2994_s3 = inlined_call_operand.vmem [shape: f32[1,32], index: 3, kind: input, shape index: {}]   ;;  %s2995_s4 = inlined_call_operand.vmem [shape: f32[512,32], index: 4, kind: output, shape index: {}]  }
   0x1   :  { %s15_s16 = sshll.u32 %s1837_s15, 4  ;;  %s1813_s19 = scalar_lea.hbm %s2991_s0, 8192  ;;  %s16_s16 = int_to_ptr.vmem [resolvable:$true] %s15_s16 }
   0x2   :  { %p1814_p0 = scmp.ne.s32.totalorder %s2991_s0, %s1813_s19  ;;  %p1817_p1 = scmp.lt.u32.totalorder %s1813_s19, %s2991_s0 }
   0x4   :  { %p1819_p2 = pnand %p1817_p1, %p1814_p0 }
   0x6   :  { %1822 = shalt.err (!%p1819_p2)
}
   0x7   :  { %s1823_s24 = scalar_lea.vmem %s16_s16, 8192  ;;  %p1828_p4 = scmp.lt.s32.totalorder %s16_s16, %s16_s16 }
   0x8   :  { %p1824_p3 = scmp.ne.s32.totalorder %s16_s16, %s1823_s24  ;;  %p1829_p5 = scmp.lt.s32.totalorder %s1823_s24, %s1823_s24 }
   0xa   :  { %p1830_p6 = por %p1829_p5, %p1828_p4 }
   0xc   :  { %p1831_p7 = pnand %p1830_p6, %p1824_p3 }
   0xe   :  { %1834 = shalt.err (!%p1831_p7)
}
   0xf   :  { %s1838_s25 = smov 128   ;;  %s1839_s26 = smov 8  }
  0x10   :  { %21 = dma.hbm_to_vmem [thread:$0]  %s2991_s0, 8192, %s16_s16, [#allocation3], %s1838_s25, %s1838_s25, %s1839_s26  }
  0x11   :  { %1835 = dma.done.wait [#allocation3], 8192  }
  0x12   :  { %1836 = vsyncadd [#allocation3], 4294959104  ;;  %v1675_v0 = vld [vmem:[%s2992_s1] sm:$0xff]   ;;  %v1676_v1 = vld [vmem:[%s2992_s1 + $0x8] sm:$0xff]   ;;  %vm481_vm0 = vcmask 261120  }
  0x13   :  { %1576 = vmatprep.subr.bf16.mxu0 %v1675_v0  ;;  %1656 = vmatprep.subr.bf16.mxu1 %v1675_v0  ;;  %v1677_v2 = vld [vmem:[%s2992_s1 + $0x10] sm:$0xff]   ;;  %v1678_v3 = vld [vmem:[%s2992_s1 + $0x18] sm:$0xff]   ;;  %v32_v4 = vld [vmem:[#allocation2] sm:$0xff] }
  0x14   :  { %1577 = vmatpush3.bf16.msra.mxu0 %v1675_v0  ;;  %1664 = vmatpush3.bf16.msra.mxu1 %v1675_v0  ;;  %v33_v5 = vld [vmem:[#allocation2 + $0x8] sm:$0xff]  ;;  %v64_v6 = vld [vmem:[#allocation2 + $0x100] sm:$0xff]  ;;  %v1681_v12 = vld [vmem:[%s2992_s1 + $0x30] sm:$0xff]  }
  0x15   :  { %1578 = vmatprep.subr.bf16.mxu0 %v1676_v1  ;;  %1657 = vmatprep.subr.bf16.mxu1 %v1676_v1  ;;  %v96_v7 = vpack.c.bf16 %v33_v5, %v32_v4  ;;  %v65_v8 = vld [vmem:[#allocation2 + $0x108] sm:$0xff]  ;;  %v1679_v10 = vld [vmem:[%s2992_s1 + $0x20] sm:$0xff]   ;;  %v1682_v13 = vld [vmem:[%s2992_s1 + $0x38] sm:$0xff]  }
  0x16   :  { %v112_v9 = vpack.c.bf16 %v65_v8, %v64_v6  ;;  %v1680_v11 = vld [vmem:[%s2992_s1 + $0x28] sm:$0xff]   ;;  %v34_v14 = vld [vmem:[#allocation2 + $0x10] sm:$0xff]  ;;  %v35_v15 = vld [vmem:[#allocation2 + $0x18] sm:$0xff] }
  0x17   :  { %1592 = vmatprep.mubr.bf16.mxu0 %v96_v7  ;;  %v66_v16 = vld [vmem:[#allocation2 + $0x110] sm:$0xff]  ;;  %v67_v17 = vld [vmem:[#allocation2 + $0x118] sm:$0xff]  ;;  %v36_v18 = vld [vmem:[#allocation2 + $0x20] sm:$0xff]  ;;  %v97_v22 = vpack.c.bf16 %v35_v15, %v34_v14 }
  0x18   :  { %1579 = vmatpush3.bf16.msra.mxu0 %v1676_v1  ;;  %1665 = vmatpush3.bf16.msra.mxu1 %v1676_v1  ;;  %v37_v19 = vld [vmem:[#allocation2 + $0x28] sm:$0xff]  ;;  %v68_v20 = vld [vmem:[#allocation2 + $0x120] sm:$0xff]  ;;  %v113_v23 = vpack.c.bf16 %v67_v17, %v66_v16  ;;  %v38_v26 = vld [vmem:[#allocation2 + $0x30] sm:$0xff] }
  0x19   :  { %1580 = vmatprep.subr.bf16.mxu0 %v1677_v2  ;;  %1658 = vmatprep.subr.bf16.mxu1 %v1677_v2  ;;  %v69_v21 = vld [vmem:[#allocation2 + $0x128] sm:$0xff]  ;;  %v98_v24 = vpack.c.bf16 %v37_v19, %v36_v18  ;;  %v39_v27 = vld [vmem:[#allocation2 + $0x38] sm:$0xff]  ;;  %v70_v28 = vld [vmem:[#allocation2 + $0x130] sm:$0xff] }
  0x1a   :  { %1624 = vmatprep.mubr.bf16.mxu1 %v112_v9  ;;  %v114_v25 = vpack.c.bf16 %v69_v21, %v68_v20  ;;  %v71_v29 = vld [vmem:[#allocation2 + $0x138] sm:$0xff]  ;;  %v40_v30 = vld [vmem:[#allocation2 + $0x40] sm:$0xff]  ;;  %v41_v31 = vld [vmem:[#allocation2 + $0x48] sm:$0xff]  ;;  %v99_v34 = vpack.c.bf16 %v39_v27, %v38_v26 }
  0x1b   :  { %v72_v32 = vld [vmem:[#allocation2 + $0x140] sm:$0xff]  ;;  %v73_v33 = vld [vmem:[#allocation2 + $0x148] sm:$0xff]  ;;  %v115_v35 = vpack.c.bf16 %v71_v29, %v70_v28  ;;  %v100_v36 = vpack.c.bf16 %v41_v31, %v40_v30  ;;  %v42_v38 = vld [vmem:[#allocation2 + $0x50] sm:$0xff] }
  0x1c   :  { %1581 = vmatpush3.bf16.msra.mxu0 %v1677_v2  ;;  %1666 = vmatpush3.bf16.msra.mxu1 %v1677_v2  ;;  %v116_v37 = vpack.c.bf16 %v73_v33, %v72_v32  ;;  %v43_v39 = vld [vmem:[#allocation2 + $0x58] sm:$0xff]  ;;  %v74_v40 = vld [vmem:[#allocation2 + $0x150] sm:$0xff]  ;;  %v44_v42 = vld [vmem:[#allocation2 + $0x60] sm:$0xff] }
  0x1d   :  { %1582 = vmatprep.subr.bf16.mxu0 %v1678_v3  ;;  %1659 = vmatprep.subr.bf16.mxu1 %v1678_v3  ;;  %v75_v41 = vld [vmem:[#allocation2 + $0x158] sm:$0xff]  ;;  %v45_v43 = vld [vmem:[#allocation2 + $0x68] sm:$0xff]  ;;  %v76_v44 = vld [vmem:[#allocation2 + $0x160] sm:$0xff]  ;;  %v101_v46 = vpack.c.bf16 %v43_v39, %v42_v38 }
  0x1e   :  { %v77_v45 = vld [vmem:[#allocation2 + $0x168] sm:$0xff]  ;;  %v117_v47 = vpack.c.bf16 %v75_v41, %v74_v40  ;;  %v102_v48 = vpack.c.bf16 %v45_v43, %v44_v42  ;;  %v46_v50 = vld [vmem:[#allocation2 + $0x70] sm:$0xff]  ;;  %v47_v51 = vld [vmem:[#allocation2 + $0x78] sm:$0xff] }
  0x1f   :  { %v118_v49 = vpack.c.bf16 %v77_v45, %v76_v44  ;;  %v78_v52 = vld [vmem:[#allocation2 + $0x170] sm:$0xff]  ;;  %v79_v53 = vld [vmem:[#allocation2 + $0x178] sm:$0xff]  ;;  %v48_v54 = vld [vmem:[#allocation2 + $0x80] sm:$0xff]  ;;  %v103_v58 = vpack.c.bf16 %v47_v51, %v46_v50 }
  0x20   :  { %1583 = vmatpush3.bf16.msra.mxu0 %v1678_v3  ;;  %1667 = vmatpush3.bf16.msra.mxu1 %v1678_v3  ;;  %v49_v55 = vld [vmem:[#allocation2 + $0x88] sm:$0xff]  ;;  %v80_v56 = vld [vmem:[#allocation2 + $0x180] sm:$0xff]  ;;  %v119_v59 = vpack.c.bf16 %v79_v53, %v78_v52  ;;  %v50_v62 = vld [vmem:[#allocation2 + $0x90] sm:$0xff] }
  0x21   :  { %1584 = vmatprep.subr.bf16.mxu0 %v1679_v10  ;;  %1660 = vmatprep.subr.bf16.mxu1 %v1679_v10  ;;  %v81_v57 = vld [vmem:[#allocation2 + $0x188] sm:$0xff]  ;;  %v104_v60 = vpack.c.bf16 %v49_v55, %v48_v54  ;;  %v51_v63 = vld [vmem:[#allocation2 + $0x98] sm:$0xff]  ;;  %v82_v0 = vld [vmem:[#allocation2 + $0x190] sm:$0xff] }
  0x22   :  { %v120_v61 = vpack.c.bf16 %v81_v57, %v80_v56  ;;  %v83_v1 = vld [vmem:[#allocation2 + $0x198] sm:$0xff]  ;;  %v52_v2 = vld [vmem:[#allocation2 + $0xa0] sm:$0xff]  ;;  %v53_v3 = vld [vmem:[#allocation2 + $0xa8] sm:$0xff]  ;;  %v105_v6 = vpack.c.bf16 %v51_v63, %v50_v62 }
  0x23   :  { %v84_v4 = vld [vmem:[#allocation2 + $0x1a0] sm:$0xff]  ;;  %v85_v5 = vld [vmem:[#allocation2 + $0x1a8] sm:$0xff]  ;;  %v121_v7 = vpack.c.bf16 %v83_v1, %v82_v0  ;;  %v106_v8 = vpack.c.bf16 %v53_v3, %v52_v2 }
  0x24   :  { %1585 = vmatpush3.bf16.msra.mxu0 %v1679_v10  ;;  %1668 = vmatpush3.bf16.msra.mxu1 %v1679_v10  ;;  %v122_v9 = vpack.c.bf16 %v85_v5, %v84_v4  ;;  %v54_v10 = vld [vmem:[#allocation2 + $0xb0] sm:$0xff]  ;;  %v56_v14 = vld [vmem:[#allocation2 + $0xc0] sm:$0xff]  ;;  %v57_v15 = vld [vmem:[#allocation2 + $0xc8] sm:$0xff] }
  0x25   :  { %1586 = vmatprep.subr.bf16.mxu0 %v1680_v11  ;;  %1661 = vmatprep.subr.bf16.mxu1 %v1680_v11  ;;  %v88_v16 = vld [vmem:[#allocation2 + $0x1c0] sm:$0xff]  ;;  %v89_v17 = vld [vmem:[#allocation2 + $0x1c8] sm:$0xff]  ;;  %v108_v20 = vpack.c.bf16 %v57_v15, %v56_v14 }
  0x26   :  { %v124_v21 = vpack.c.bf16 %v89_v17, %v88_v16  ;;  %v60_v26 = vld [vmem:[#allocation2 + $0xe0] sm:$0xff]  ;;  %v61_v27 = vld [vmem:[#allocation2 + $0xe8] sm:$0xff] }
  0x27   :  { %v92_v28 = vld [vmem:[#allocation2 + $0x1e0] sm:$0xff]  ;;  %v93_v29 = vld [vmem:[#allocation2 + $0x1e8] sm:$0xff]  ;;  %v110_v32 = vpack.c.bf16 %v61_v27, %v60_v26 }
  0x28   :  { %1587 = vmatpush3.bf16.msra.mxu0 %v1680_v11  ;;  %1669 = vmatpush3.bf16.msra.mxu1 %v1680_v11  ;;  %v55_v11 = vld [vmem:[#allocation2 + $0xb8] sm:$0xff]  ;;  %v126_v33 = vpack.c.bf16 %v93_v29, %v92_v28 }
  0x29   :  { %1588 = vmatprep.subr.bf16.mxu0 %v1681_v12  ;;  %1662 = vmatprep.subr.bf16.mxu1 %v1681_v12  ;;  %v107_v18 = vpack.c.bf16 %v55_v11, %v54_v10 }
  0x2c   :  { %1589 = vmatpush3.bf16.msra.mxu0 %v1681_v12  ;;  %1670 = vmatpush3.bf16.msra.mxu1 %v1681_v12  ;;  %v86_v12 = vld [vmem:[#allocation2 + $0x1b0] sm:$0xff] }
  0x2d   :  { %1590 = vmatprep.subr.bf16.mxu0 %v1682_v13  ;;  %1663 = vmatprep.subr.bf16.mxu1 %v1682_v13 }
  0x30   :  { %1591 = vmatpush3.bf16.msra.mxu0 %v1682_v13  ;;  %1671 = vmatpush3.bf16.msra.mxu1 %v1682_v13  ;;  %v87_v13 = vld [vmem:[#allocation2 + $0x1b8] sm:$0xff] }
  0x31   :  { %v123_v19 = vpack.c.bf16 %v87_v13, %v86_v12 }
  0x33   :  { %1593 = vmatmul.mubr.bf16.vlgmr.msra.gmra.mrb[0].mxu0 %v97_v22  ;;  %1625 = vmatmul.mubr.bf16.vlgmr.msra.gmra.mrb[0].mxu1 %v113_v23  ;;  %v58_v22 = vld [vmem:[#allocation2 + $0xd0] sm:$0xff]  ;;  %v59_v23 = vld [vmem:[#allocation2 + $0xd8] sm:$0xff] }
  0x34   :  { %1596 = vmatprep.mubr.bf16.mxu0 %v98_v24  ;;  %1628 = vmatprep.mubr.bf16.mxu1 %v114_v25  ;;  %v90_v24 = vld [vmem:[#allocation2 + $0x1d0] sm:$0xff]  ;;  %v91_v25 = vld [vmem:[#allocation2 + $0x1d8] sm:$0xff]  ;;  %v109_v30 = vpack.c.bf16 %v59_v23, %v58_v22 }
  0x35   :  { %v125_v31 = vpack.c.bf16 %v91_v25, %v90_v24 }
  0x3b   :  { %1597 = vmatmul.mubr.bf16.gmra.mrb[4].mxu0 %v99_v34  ;;  %1629 = vmatmul.mubr.bf16.gmra.mrb[4].mxu1 %v115_v35  ;;  %v62_v34 = vld [vmem:[#allocation2 + $0xf0] sm:$0xff]  ;;  %v63_v35 = vld [vmem:[#allocation2 + $0xf8] sm:$0xff] }
  0x3c   :  { %1600 = vmatprep.mubr.bf16.mxu0 %v100_v36  ;;  %1632 = vmatprep.mubr.bf16.mxu1 %v116_v37  ;;  %v94_v36 = vld [vmem:[#allocation2 + $0x1f0] sm:$0xff]  ;;  %v95_v37 = vld [vmem:[#allocation2 + $0x1f8] sm:$0xff]  ;;  %v111_v38 = vpack.c.bf16 %v63_v35, %v62_v34 }
  0x3d   :  { %v127_v39 = vpack.c.bf16 %v95_v37, %v94_v36 }
  0x43   :  { %1601 = vmatmul.mubr.bf16.gmra.mrb[8].mxu0 %v101_v46  ;;  %1633 = vmatmul.mubr.bf16.gmra.mrb[8].mxu1 %v117_v47 }
  0x44   :  { %1604 = vmatprep.mubr.bf16.mxu0 %v102_v48  ;;  %1636 = vmatprep.mubr.bf16.mxu1 %v118_v49 }
  0x4b   :  { %1605 = vmatmul.mubr.bf16.gmra.mrb[12].mxu0 %v103_v58  ;;  %1637 = vmatmul.mubr.bf16.gmra.mrb[12].mxu1 %v119_v59 }
  0x4c   :  { %1608 = vmatprep.mubr.bf16.mxu0 %v104_v60  ;;  %1640 = vmatprep.mubr.bf16.mxu1 %v120_v61 }
  0x53   :  { %1609 = vmatmul.mubr.bf16.gmra.mrb[16].mxu0 %v105_v6  ;;  %1641 = vmatmul.mubr.bf16.gmra.mrb[16].mxu1 %v121_v7 }
  0x54   :  { %1612 = vmatprep.mubr.bf16.mxu0 %v106_v8  ;;  %1644 = vmatprep.mubr.bf16.mxu1 %v122_v9 }
  0x5b   :  { %1613 = vmatmul.mubr.bf16.gmra.mrb[20].mxu0 %v107_v18  ;;  %1645 = vmatmul.mubr.bf16.gmra.mrb[20].mxu1 %v123_v19 }
  0x5c   :  { %1616 = vmatprep.mubr.bf16.mxu0 %v108_v20  ;;  %1648 = vmatprep.mubr.bf16.mxu1 %v124_v21 }
  0x63   :  { %1617 = vmatmul.mubr.bf16.gmra.mrb[24].mxu0 %v109_v30  ;;  %1649 = vmatmul.mubr.bf16.gmra.mrb[24].mxu1 %v125_v31 }
  0x64   :  { %1620 = vmatprep.mubr.bf16.mxu0 %v110_v32  ;;  %1652 = vmatprep.mubr.bf16.mxu1 %v126_v33 }
  0x6b   :  { %1621 = vmatmul.mubr.bf16.gmra.mrb[28].mxu0 %v111_v38  ;;  %1653 = vmatmul.mubr.bf16.gmra.mrb[28].mxu1 %v127_v39 }
 0x106   :  { %v1901_v40 = vpop.f32.mrb[0].mxu0  ;;  %v1903_v41 = vpop.f32.mrb[0].mxu1 }
 0x107   :  { %v1905_v42 = vpop.f32.mrb[1].mxu0  ;;  %v1907_v43 = vpop.f32.mrb[1].mxu1  ;;  %v584_v44 = vsel %vm481_vm0, %v1903_v41, 0.0  ;;  %v488_v45 = vsel %vm481_vm0, %v1901_v40, 0.0 }
 0x108   :  { %585 = vadd.xlane.f32.xlu0 %v584_v44  ;;  %v1913_v46 = vpop.f32.mrb[2].mxu1  ;;  %489 = vadd.xlane.f32.xlu1 %v488_v45  ;;  %v1915_v47 = vpop.f32.mrb[2].mxu0  ;;  %v482_v50 = vsel %vm481_vm0, %v1905_v42, 0.0  ;;  %v578_v54 = vsel %vm481_vm0, %v1907_v43, 0.0 }
 0x109   :  { %v1917_v48 = vpop.f32.mrb[3].mxu0  ;;  %v1919_v49 = vpop.f32.mrb[3].mxu1  ;;  %v491_v51 = vsel %vm481_vm0, %v1915_v47, 0.0  ;;  %v587_v55 = vsel %vm481_vm0, %v1913_v46, 0.0 }
 0x10a   :  { %v581_v62 = vsel %vm481_vm0, %v1919_v49, 0.0  ;;  %v485_v63 = vsel %vm481_vm0, %v1917_v48, 0.0 }
 0x10c   :  { %483 = vadd.xlane.f32.xlu0 %v482_v50  ;;  %492 = vadd.xlane.f32.xlu1 %v491_v51 }
 0x10e   :  { %v1925_v52 = vpop.f32.mrb[4].mxu0  ;;  %v1927_v53 = vpop.f32.mrb[4].mxu1 }
 0x10f   :  { %v1933_v56 = vpop.f32.mrb[5].mxu0  ;;  %v1935_v57 = vpop.f32.mrb[5].mxu1  ;;  %v500_v2 = vsel %vm481_vm0, %v1925_v52, 0.0  ;;  %v596_v10 = vsel %vm481_vm0, %v1927_v53, 0.0 }
 0x110   :  { %579 = vadd.xlane.f32.xlu0 %v578_v54  ;;  %588 = vadd.xlane.f32.xlu1 %v587_v55  ;;  %v1937_v58 = vpop.f32.mrb[6].mxu0  ;;  %v1939_v59 = vpop.f32.mrb[6].mxu1  ;;  %v494_v14 = vsel %vm481_vm0, %v1933_v56, 0.0  ;;  %v590_v22 = vsel %vm481_vm0, %v1935_v57, 0.0 }
 0x111   :  { %v1941_v60 = vpop.f32.mrb[7].mxu0  ;;  %v1943_v61 = vpop.f32.mrb[7].mxu1  ;;  %v503_v3 = vsel %vm481_vm0, %v1937_v58, 0.0  ;;  %v599_v11 = vsel %vm481_vm0, %v1939_v59, 0.0 }
 0x112   :  { %v497_v15 = vsel %vm481_vm0, %v1941_v60, 0.0  ;;  %v593_v23 = vsel %vm481_vm0, %v1943_v61, 0.0 }
 0x114   :  { %582 = vadd.xlane.f32.xlu1 %v581_v62  ;;  %486 = vadd.xlane.f32.xlu0 %v485_v63 }
 0x116   :  { %v1949_v0 = vpop.f32.mrb[8].mxu0  ;;  %v1951_v1 = vpop.f32.mrb[8].mxu1 }
 0x117   :  { %v1957_v4 = vpop.f32.mrb[9].mxu0  ;;  %v1959_v5 = vpop.f32.mrb[9].mxu1  ;;  %v512_v26 = vsel %vm481_vm0, %v1949_v0, 0.0  ;;  %v608_v34 = vsel %vm481_vm0, %v1951_v1, 0.0 }
 0x118   :  { %501 = vadd.xlane.f32.xlu0 %v500_v2  ;;  %504 = vadd.xlane.f32.xlu1 %v503_v3  ;;  %v1961_v6 = vpop.f32.mrb[10].mxu0  ;;  %v1963_v7 = vpop.f32.mrb[10].mxu1  ;;  %v506_v38 = vsel %vm481_vm0, %v1957_v4, 0.0  ;;  %v602_v62 = vsel %vm481_vm0, %v1959_v5, 0.0 }
 0x119   :  { %v1965_v8 = vpop.f32.mrb[11].mxu0  ;;  %v1967_v9 = vpop.f32.mrb[11].mxu1  ;;  %v515_v27 = vsel %vm481_vm0, %v1961_v6, 0.0  ;;  %v611_v35 = vsel %vm481_vm0, %v1963_v7, 0.0 }
 0x11a   :  { %v509_v39 = vsel %vm481_vm0, %v1965_v8, 0.0  ;;  %v605_v63 = vsel %vm481_vm0, %v1967_v9, 0.0 }
 0x11c   :  { %597 = vadd.xlane.f32.xlu0 %v596_v10  ;;  %600 = vadd.xlane.f32.xlu1 %v599_v11 }
 0x11e   :  { %v1973_v12 = vpop.f32.mrb[12].mxu0  ;;  %v1975_v13 = vpop.f32.mrb[12].mxu1 }
 0x11f   :  { %3029 = vst [vmem:[#allocation5_spill] sm:$0xff] %v1973_v12  ;;  %3030 = vst [vmem:[#allocation6_spill] sm:$0xff] %v1975_v13  ;;  %v1981_v16 = vpop.f32.mrb[13].mxu0  ;;  %v1983_v17 = vpop.f32.mrb[13].mxu1  ;;  %v524_v10 = vsel %vm481_vm0, %v1973_v12, 0.0 }
 0x120   :  { %3031 = vst [vmem:[#allocation7_spill] sm:$0xff] %v1981_v16  ;;  %495 = vadd.xlane.f32.xlu0 %v494_v14  ;;  %498 = vadd.xlane.f32.xlu1 %v497_v15  ;;  %v1985_v18 = vpop.f32.mrb[14].mxu0  ;;  %v1987_v19 = vpop.f32.mrb[14].mxu1 }
 0x121   :  { %3032 = vst [vmem:[#allocation8_spill] sm:$0xff] %v1985_v18  ;;  %3033 = vst [vmem:[#allocation9_spill] sm:$0xff] %v1987_v19  ;;  %v1989_v20 = vpop.f32.mrb[15].mxu0  ;;  %v1991_v21 = vpop.f32.mrb[15].mxu1  ;;  %v527_v11 = vsel %vm481_vm0, %v1985_v18, 0.0 }
 0x122   :  { %3034 = vst [vmem:[#allocation10_spill] sm:$0xff] %v1989_v20 }
 0x124   :  { %591 = vadd.xlane.f32.xlu0 %v590_v22  ;;  %594 = vadd.xlane.f32.xlu1 %v593_v23 }
 0x126   :  { %v1997_v24 = vpop.f32.mrb[16].mxu0  ;;  %v1999_v25 = vpop.f32.mrb[16].mxu1 }
 0x127   :  { %v2005_v28 = vpop.f32.mrb[17].mxu0  ;;  %v2007_v29 = vpop.f32.mrb[17].mxu1  ;;  %v632_v18 = vsel %vm481_vm0, %v1999_v25, 0.0 }
 0x128   :  { %513 = vadd.xlane.f32.xlu0 %v512_v26  ;;  %516 = vadd.xlane.f32.xlu1 %v515_v27  ;;  %v2009_v30 = vpop.f32.mrb[18].mxu0  ;;  %v2011_v31 = vpop.f32.mrb[18].mxu1 }
 0x129   :  { %v2013_v32 = vpop.f32.mrb[19].mxu0  ;;  %v2015_v33 = vpop.f32.mrb[19].mxu1  ;;  %v635_v12 = vsel %vm481_vm0, %v2011_v31, 0.0 }
 0x12c   :  { %609 = vadd.xlane.f32.xlu0 %v608_v34  ;;  %612 = vadd.xlane.f32.xlu1 %v611_v35  ;;  %v620_v34 = vsel %vm481_vm0, %v1975_v13, 0.0  ;;  %v623_v35 = vsel %vm481_vm0, %v1987_v19, 0.0 }
 0x12e   :  { %v2021_v36 = vpop.f32.mrb[20].mxu0  ;;  %v2023_v37 = vpop.f32.mrb[20].mxu1 }
 0x12f   :  { %v2029_v44 = vpop.f32.mrb[21].mxu0  ;;  %v2031_v45 = vpop.f32.mrb[21].mxu1 }
 0x130   :  { %507 = vadd.xlane.f32.xlu0 %v506_v38  ;;  %510 = vadd.xlane.f32.xlu1 %v509_v39  ;;  %v2033_v50 = vpop.f32.mrb[22].mxu0  ;;  %v2035_v51 = vpop.f32.mrb[22].mxu1 }
 0x131   :  { %v2037_v54 = vpop.f32.mrb[23].mxu0  ;;  %v2039_v55 = vpop.f32.mrb[23].mxu1 }
 0x134   :  { %603 = vadd.xlane.f32.xlu0 %v602_v62  ;;  %606 = vadd.xlane.f32.xlu1 %v605_v63  ;;  %v518_v62 = vsel %vm481_vm0, %v1981_v16, 0.0  ;;  %v521_v63 = vsel %vm481_vm0, %v1989_v20, 0.0  ;;  %v614_v16 = vsel %vm481_vm0, %v1983_v17, 0.0  ;;  %v617_v20 = vsel %vm481_vm0, %v1991_v21, 0.0 }
 0x136   :  { %v2045_v2 = vpop.f32.mrb[24].mxu0  ;;  %v2047_v3 = vpop.f32.mrb[24].mxu1 }
 0x137   :  { %v2053_v14 = vpop.f32.mrb[25].mxu0  ;;  %v2055_v15 = vpop.f32.mrb[25].mxu1 }
 0x138   :  { %525 = vadd.xlane.f32.xlu0 %v524_v10  ;;  %528 = vadd.xlane.f32.xlu1 %v527_v11  ;;  %v2057_v22 = vpop.f32.mrb[26].mxu0  ;;  %v2059_v23 = vpop.f32.mrb[26].mxu1 }
 0x139   :  { %v2061_v26 = vpop.f32.mrb[27].mxu0  ;;  %v2063_v27 = vpop.f32.mrb[27].mxu1 }
 0x13c   :  { %621 = vadd.xlane.f32.xlu0 %v620_v34  ;;  %624 = vadd.xlane.f32.xlu1 %v623_v35 }
 0x13e   :  { %v2069_v38 = vpop.f32.mrb[28].mxu0  ;;  %v2071_v39 = vpop.f32.mrb[28].mxu1 }
 0x13f   :  { %3035 = vst [vmem:[#allocation11_spill] sm:$0xff] %v2069_v38  ;;  %3036 = vst [vmem:[#allocation12_spill] sm:$0xff] %v2071_v39  ;;  %v2077_v10 = vpop.f32.mrb[29].mxu0  ;;  %v2079_v11 = vpop.f32.mrb[29].mxu1 }
 0x140   :  { %3037 = vst [vmem:[#allocation13_spill] sm:$0xff] %v2077_v10  ;;  %3038 = vst [vmem:[#allocation14_spill] sm:$0xff] %v2079_v11  ;;  %519 = vadd.xlane.f32.xlu0 %v518_v62  ;;  %522 = vadd.xlane.f32.xlu1 %v521_v63  ;;  %v2081_v13 = vpop.f32.mrb[30].mxu0  ;;  %v2083_v34 = vpop.f32.mrb[30].mxu1  ;;  %v536_v62 = vsel %vm481_vm0, %v1997_v24, 0.0  ;;  %v539_v63 = vsel %vm481_vm0, %v2009_v30, 0.0 }
 0x141   :  { %3039 = vst [vmem:[#allocation15_spill] sm:$0xff] %v2081_v13  ;;  %3040 = vst [vmem:[#allocation16_spill] sm:$0xff] %v2083_v34  ;;  %v2085_v35 = vpop.f32.mrb[31].mxu0  ;;  %v2087_v19 = vpop.f32.mrb[31].mxu1 }
 0x142   :  { %3041 = vst [vmem:[#allocation17_spill] sm:$0xff] %v2085_v35 }
 0x144   :  { %615 = vadd.xlane.f32.xlu0 %v614_v16  ;;  %618 = vadd.xlane.f32.xlu1 %v617_v20  ;;  %v530_v16 = vsel %vm481_vm0, %v2005_v28, 0.0  ;;  %v533_v20 = vsel %vm481_vm0, %v2013_v32, 0.0 }
 0x148   :  { %537 = vadd.xlane.f32.xlu0 %v536_v62  ;;  %540 = vadd.xlane.f32.xlu1 %v539_v63  ;;  %v626_v62 = vsel %vm481_vm0, %v2007_v29, 0.0  ;;  %v629_v63 = vsel %vm481_vm0, %v2015_v33, 0.0 }
 0x14c   :  { %633 = vadd.xlane.f32.xlu0 %v632_v18  ;;  %636 = vadd.xlane.f32.xlu1 %v635_v12  ;;  %v548_v18 = vsel %vm481_vm0, %v2021_v36, 0.0  ;;  %v551_v12 = vsel %vm481_vm0, %v2033_v50, 0.0 }
 0x150   :  { %531 = vadd.xlane.f32.xlu0 %v530_v16  ;;  %534 = vadd.xlane.f32.xlu1 %v533_v20  ;;  %v644_v16 = vsel %vm481_vm0, %v2023_v37, 0.0  ;;  %v647_v20 = vsel %vm481_vm0, %v2035_v51, 0.0 }
 0x154   :  { %627 = vadd.xlane.f32.xlu0 %v626_v62  ;;  %630 = vadd.xlane.f32.xlu1 %v629_v63  ;;  %v542_v62 = vsel %vm481_vm0, %v2029_v44, 0.0  ;;  %v545_v63 = vsel %vm481_vm0, %v2037_v54, 0.0 }
 0x158   :  { %549 = vadd.xlane.f32.xlu0 %v548_v18  ;;  %552 = vadd.xlane.f32.xlu1 %v551_v12  ;;  %v638_v18 = vsel %vm481_vm0, %v2031_v45, 0.0  ;;  %v641_v12 = vsel %vm481_vm0, %v2039_v55, 0.0 }
 0x15c   :  { %645 = vadd.xlane.f32.xlu0 %v644_v16  ;;  %648 = vadd.xlane.f32.xlu1 %v647_v20  ;;  %v560_v16 = vsel %vm481_vm0, %v2045_v2, 0.0  ;;  %v563_v20 = vsel %vm481_vm0, %v2057_v22, 0.0 }
 0x160   :  { %543 = vadd.xlane.f32.xlu0 %v542_v62  ;;  %546 = vadd.xlane.f32.xlu1 %v545_v63  ;;  %v656_v62 = vsel %vm481_vm0, %v2047_v3, 0.0  ;;  %v659_v63 = vsel %vm481_vm0, %v2059_v23, 0.0 }
 0x164   :  { %639 = vadd.xlane.f32.xlu0 %v638_v18  ;;  %642 = vadd.xlane.f32.xlu1 %v641_v12  ;;  %v554_v18 = vsel %vm481_vm0, %v2053_v14, 0.0  ;;  %v557_v12 = vsel %vm481_vm0, %v2061_v26, 0.0 }
 0x168   :  { %561 = vadd.xlane.f32.xlu0 %v560_v16  ;;  %564 = vadd.xlane.f32.xlu1 %v563_v20  ;;  %v650_v16 = vsel %vm481_vm0, %v2055_v15, 0.0  ;;  %v653_v20 = vsel %vm481_vm0, %v2063_v27, 0.0 }
 0x16c   :  { %657 = vadd.xlane.f32.xlu0 %v656_v62  ;;  %660 = vadd.xlane.f32.xlu1 %v659_v63  ;;  %v572_v62 = vsel %vm481_vm0, %v2069_v38, 0.0  ;;  %v575_v63 = vsel %vm481_vm0, %v2081_v13, 0.0 }
 0x170   :  { %555 = vadd.xlane.f32.xlu0 %v554_v18  ;;  %558 = vadd.xlane.f32.xlu1 %v557_v12  ;;  %v668_v18 = vsel %vm481_vm0, %v2071_v39, 0.0  ;;  %v671_v12 = vsel %vm481_vm0, %v2083_v34, 0.0 }
 0x174   :  { %651 = vadd.xlane.f32.xlu0 %v650_v16  ;;  %654 = vadd.xlane.f32.xlu1 %v653_v20  ;;  %v566_v16 = vsel %vm481_vm0, %v2077_v10, 0.0  ;;  %v569_v20 = vsel %vm481_vm0, %v2085_v35, 0.0 }
 0x178   :  { %573 = vadd.xlane.f32.xlu0 %v572_v62  ;;  %576 = vadd.xlane.f32.xlu1 %v575_v63  ;;  %v662_v62 = vsel %vm481_vm0, %v2079_v11, 0.0  ;;  %v665_v63 = vsel %vm481_vm0, %v2087_v19, 0.0 }
 0x17c   :  { %669 = vadd.xlane.f32.xlu0 %v668_v18  ;;  %672 = vadd.xlane.f32.xlu1 %v671_v12 }
 0x180   :  { %567 = vadd.xlane.f32.xlu0 %v566_v16  ;;  %570 = vadd.xlane.f32.xlu1 %v569_v20 }
 0x184   :  { %663 = vadd.xlane.f32.xlu0 %v662_v62  ;;  %666 = vadd.xlane.f32.xlu1 %v665_v63 }
 0x195   :  { %v586_v39 = vpop.xlane.xlu0 %585  ;;  %v490_v34 = vpop.xlane.xlu1 %489 }
 0x196   :  { %v709_v18 = vmul.f32 0.03125, %v586_v39  ;;  %v677_v12 = vmul.f32 0.03125, %v490_v34 }
 0x198   :  { %v2158_v13 = vsub.f32 %v1903_v41, %v709_v18  ;;  %v2161_v10 = vsub.f32 %v1901_v40, %v677_v12 }
 0x199   :  { %v484_v16 = vpop.xlane.xlu0 %483  ;;  %v493_v20 = vpop.xlane.xlu1 %492 }
 0x19a   :  { %3042 = vst [vmem:[#allocation18_spill] sm:$0xff] %v2158_v13  ;;  %v675_v35 = vmul.f32 0.03125, %v484_v16  ;;  %v678_v38 = vmul.f32 0.03125, %v493_v20  ;;  %v805_v11 = vmul.f32 %v2161_v10, %v2161_v10  ;;  %v837_v62 = vmul.f32 %v2158_v13, %v2158_v13 }
 0x19c   :  { %v2168_v63 = vsub.f32 %v1905_v42, %v675_v35  ;;  %v2171_v39 = vsub.f32 %v1915_v47, %v678_v38  ;;  %v873_v41 = vsel %vm481_vm0, %v805_v11, 0.0  ;;  %v969_v20 = vsel %vm481_vm0, %v837_v62, 0.0 }
 0x19d   :  { %v580_v40 = vpop.xlane.xlu0 %579  ;;  %v589_v34 = vpop.xlane.xlu1 %588  ;;  %874 = vadd.xlane.f32.xlu0 %v873_v41 }
 0x19e   :  { %v707_v18 = vmul.f32 0.03125, %v580_v40  ;;  %v710_v12 = vmul.f32 0.03125, %v589_v34  ;;  %v806_v16 = vmul.f32 %v2171_v39, %v2171_v39  ;;  %v803_v38 = vmul.f32 %v2168_v63, %v2168_v63 }
 0x1a0   :  { %v2178_v13 = vsub.f32 %v1907_v43, %v707_v18  ;;  %v2181_v42 = vsub.f32 %v1913_v46, %v710_v12  ;;  %v876_v47 = vsel %vm481_vm0, %v806_v16, 0.0  ;;  %v867_v18 = vsel %vm481_vm0, %v803_v38, 0.0 }
 0x1a1   :  { %v583_v11 = vpop.xlane.xlu1 %582  ;;  %v487_v35 = vpop.xlane.xlu0 %486  ;;  %970 = vadd.xlane.f32.xlu0 %v969_v20  ;;  %877 = vadd.xlane.f32.xlu1 %v876_v47 }
 0x1a2   :  { %3043 = vst [vmem:[#allocation19_spill] sm:$0xff] %v2178_v13  ;;  %v708_v41 = vmul.f32 0.03125, %v583_v11  ;;  %v676_v40 = vmul.f32 0.03125, %v487_v35  ;;  %v838_v62 = vmul.f32 %v2181_v42, %v2181_v42  ;;  %v835_v43 = vmul.f32 %v2178_v13, %v2178_v13 }
 0x1a4   :  { %v2191_v46 = vsub.f32 %v1919_v49, %v708_v41  ;;  %v2194_v34 = vsub.f32 %v1917_v48, %v676_v40  ;;  %v972_v12 = vsel %vm481_vm0, %v838_v62, 0.0  ;;  %v963_v13 = vsel %vm481_vm0, %v835_v43, 0.0 }
 0x1a5   :  { %v502_v16 = vpop.xlane.xlu0 %501  ;;  %v505_v20 = vpop.xlane.xlu1 %504  ;;  %868 = vadd.xlane.f32.xlu0 %v867_v18  ;;  %973 = vadd.xlane.f32.xlu1 %v972_v12 }
 0x1a6   :  { %v681_v47 = vmul.f32 0.03125, %v502_v16  ;;  %v682_v11 = vmul.f32 0.03125, %v505_v20  ;;  %v804_v35 = vmul.f32 %v2194_v34, %v2194_v34  ;;  %v836_v41 = vmul.f32 %v2191_v46, %v2191_v46 }
 0x1a8   :  { %v2202_v49 = vsub.f32 %v1925_v52, %v681_v47  ;;  %v2205_v48 = vsub.f32 %v1937_v58, %v682_v11  ;;  %v870_v38 = vsel %vm481_vm0, %v804_v35, 0.0  ;;  %v966_v47 = vsel %vm481_vm0, %v836_v41, 0.0 }
 0x1a9   :  { %v598_v40 = vpop.xlane.xlu0 %597  ;;  %v601_v62 = vpop.xlane.xlu1 %600  ;;  %964 = vadd.xlane.f32.xlu0 %v963_v13  ;;  %871 = vadd.xlane.f32.xlu1 %v870_v38 }
 0x1aa   :  { %v713_v18 = vmul.f32 0.03125, %v598_v40  ;;  %v714_v12 = vmul.f32 0.03125, %v601_v62  ;;  %v809_v43 = vmul.f32 %v2202_v49, %v2202_v49  ;;  %v810_v52 = vmul.f32 %v2205_v48, %v2205_v48 }
 0x1ac   :  { %v2215_v58 = vsub.f32 %v1927_v53, %v713_v18  ;;  %v2218_v16 = vsub.f32 %v1939_v59, %v714_v12  ;;  %v885_v20 = vsel %vm481_vm0, %v809_v43, 0.0  ;;  %v888_v62 = vsel %vm481_vm0, %v810_v52, 0.0 }
 0x1ad   :  { %v496_v13 = vpop.xlane.xlu0 %495  ;;  %v499_v11 = vpop.xlane.xlu1 %498  ;;  %886 = vadd.xlane.f32.xlu0 %v885_v20  ;;  %967 = vadd.xlane.f32.xlu1 %v966_v47 }
 0x1ae   :  { %v679_v35 = vmul.f32 0.03125, %v496_v13  ;;  %v680_v38 = vmul.f32 0.03125, %v499_v11  ;;  %v841_v40 = vmul.f32 %v2215_v58, %v2215_v58  ;;  %v842_v41 = vmul.f32 %v2218_v16, %v2218_v16 }
 0x1b0   :  { %v2226_v53 = vsub.f32 %v1933_v56, %v679_v35  ;;  %v2229_v59 = vsub.f32 %v1941_v60, %v680_v38  ;;  %v981_v18 = vsel %vm481_vm0, %v841_v40, 0.0  ;;  %v984_v35 = vsel %vm481_vm0, %v842_v41, 0.0 }
 0x1b1   :  { %v592_v12 = vpop.xlane.xlu0 %591  ;;  %v595_v43 = vpop.xlane.xlu1 %594  ;;  %982 = vadd.xlane.f32.xlu0 %v981_v18  ;;  %889 = vadd.xlane.f32.xlu1 %v888_v62 }
 0x1b2   :  { %v711_v20 = vmul.f32 0.03125, %v592_v12  ;;  %v712_v47 = vmul.f32 0.03125, %v595_v43  ;;  %v807_v52 = vmul.f32 %v2226_v53, %v2226_v53  ;;  %v808_v56 = vmul.f32 %v2229_v59, %v2229_v59 }
 0x1b4   :  { %v2239_v60 = vsub.f32 %v1935_v57, %v711_v20  ;;  %v2242_v13 = vsub.f32 %v1943_v61, %v712_v47  ;;  %v879_v11 = vsel %vm481_vm0, %v807_v52, 0.0  ;;  %v882_v43 = vsel %vm481_vm0, %v808_v56, 0.0 }
 0x1b5   :  { %v514_v38 = vpop.xlane.xlu0 %513  ;;  %v517_v40 = vpop.xlane.xlu1 %516  ;;  %880 = vadd.xlane.f32.xlu0 %v879_v11  ;;  %985 = vadd.xlane.f32.xlu1 %v984_v35 }
 0x1b6   :  { %v685_v62 = vmul.f32 0.03125, %v514_v38  ;;  %v686_v18 = vmul.f32 0.03125, %v517_v40  ;;  %v839_v12 = vmul.f32 %v2239_v60, %v2239_v60  ;;  %v840_v41 = vmul.f32 %v2242_v13, %v2242_v13 }
 0x1b8   :  { %v2250_v57 = vsub.f32 %v1949_v0, %v685_v62  ;;  %v2253_v61 = vsub.f32 %v1961_v6, %v686_v18  ;;  %v975_v20 = vsel %vm481_vm0, %v839_v12, 0.0  ;;  %v978_v62 = vsel %vm481_vm0, %v840_v41, 0.0 }
 0x1b9   :  { %v610_v47 = vpop.xlane.xlu0 %609  ;;  %v613_v52 = vpop.xlane.xlu1 %612  ;;  %976 = vadd.xlane.f32.xlu0 %v975_v20  ;;  %883 = vadd.xlane.f32.xlu1 %v882_v43 }
 0x1ba   :  { %v717_v11 = vmul.f32 0.03125, %v610_v47  ;;  %v718_v35 = vmul.f32 0.03125, %v613_v52  ;;  %v813_v56 = vmul.f32 %v2250_v57, %v2250_v57  ;;  %v814_v0 = vmul.f32 %v2253_v61, %v2253_v61 }
 0x1bc   :  { %v2263_v6 = vsub.f32 %v1951_v1, %v717_v11  ;;  %v2266_v38 = vsub.f32 %v1963_v7, %v718_v35  ;;  %v897_v40 = vsel %vm481_vm0, %v813_v56, 0.0  ;;  %v900_v52 = vsel %vm481_vm0, %v814_v0, 0.0 }
 0x1bd   :  { %v508_v18 = vpop.xlane.xlu0 %507  ;;  %v511_v12 = vpop.xlane.xlu1 %510  ;;  %898 = vadd.xlane.f32.xlu0 %v897_v40  ;;  %979 = vadd.xlane.f32.xlu1 %v978_v62 }
 0x1be   :  { %v683_v43 = vmul.f32 0.03125, %v508_v18  ;;  %v684_v20 = vmul.f32 0.03125, %v511_v12  ;;  %v845_v47 = vmul.f32 %v2263_v6, %v2263_v6  ;;  %v846_v41 = vmul.f32 %v2266_v38, %v2266_v38 }
 0x1c0   :  { %v2274_v1 = vsub.f32 %v1957_v4, %v683_v43  ;;  %v2277_v7 = vsub.f32 %v1965_v8, %v684_v20  ;;  %v993_v11 = vsel %vm481_vm0, %v845_v47, 0.0  ;;  %v996_v43 = vsel %vm481_vm0, %v846_v41, 0.0 }
 0x1c1   :  { %v604_v35 = vpop.xlane.xlu0 %603  ;;  %v607_v56 = vpop.xlane.xlu1 %606  ;;  %994 = vadd.xlane.f32.xlu0 %v993_v11  ;;  %901 = vadd.xlane.f32.xlu1 %v900_v52 }
 0x1c2   :  { %3044 = vst [vmem:[#allocation20_spill] sm:$0xff] %v2277_v7  ;;  %v715_v40 = vmul.f32 0.03125, %v604_v35  ;;  %v716_v62 = vmul.f32 0.03125, %v607_v56  ;;  %v811_v0 = vmul.f32 %v2274_v1, %v2274_v1  ;;  %v812_v4 = vmul.f32 %v2277_v7, %v2277_v7 }
 0x1c4   :  { %v2287_v8 = vsub.f32 %v1959_v5, %v715_v40  ;;  %v2290_v18 = vsub.f32 %v1967_v9, %v716_v62  ;;  %v891_v12 = vsel %vm481_vm0, %v811_v0, 0.0  ;;  %v894_v56 = vsel %vm481_vm0, %v812_v4, 0.0  ;;  %v3046_v5 = vld [vmem:[#allocation5_spill] sm:$0xff]  ;;  %v3048_v9 = vld [vmem:[#allocation8_spill] sm:$0xff] }
 0x1c5   :  { %v526_v20 = vpop.xlane.xlu0 %525  ;;  %v529_v47 = vpop.xlane.xlu1 %528  ;;  %892 = vadd.xlane.f32.xlu0 %v891_v12  ;;  %997 = vadd.xlane.f32.xlu1 %v996_v43 }
 0x1c6   :  { %3045 = vst [vmem:[#allocation21_spill] sm:$0xff] %v2290_v18  ;;  %v689_v52 = vmul.f32 0.03125, %v526_v20  ;;  %v690_v11 = vmul.f32 0.03125, %v529_v47  ;;  %v843_v35 = vmul.f32 %v2287_v8, %v2287_v8  ;;  %v844_v41 = vmul.f32 %v2290_v18, %v2290_v18 }
 0x1c8   :  { %v2298_v40 = vsub.f32 %v3046_v5, %v689_v52  ;;  %v2301_v62 = vsub.f32 %v3048_v9, %v690_v11  ;;  %v987_v0 = vsel %vm481_vm0, %v843_v35, 0.0  ;;  %v3050_v5 = vld [vmem:[#allocation6_spill] sm:$0xff]  ;;  %v3051_v9 = vld [vmem:[#allocation9_spill] sm:$0xff]  ;;  %v990_v7 = vsel %vm481_vm0, %v844_v41, 0.0 }
 0x1c9   :  { %v622_v12 = vpop.xlane.xlu0 %621  ;;  %v625_v43 = vpop.xlane.xlu1 %624  ;;  %988 = vadd.xlane.f32.xlu0 %v987_v0  ;;  %895 = vadd.xlane.f32.xlu1 %v894_v56 }
 0x1ca   :  { %3047 = vst [vmem:[#allocation5_spill] sm:$0xff] %v2298_v40  ;;  %3049 = vst [vmem:[#allocation8_spill] sm:$0xff] %v2301_v62  ;;  %v721_v20 = vmul.f32 0.03125, %v622_v12  ;;  %v722_v47 = vmul.f32 0.03125, %v625_v43  ;;  %v817_v4 = vmul.f32 %v2298_v40, %v2298_v40  ;;  %v818_v52 = vmul.f32 %v2301_v62, %v2301_v62 }
 0x1cc   :  { %v2311_v11 = vsub.f32 %v3050_v5, %v721_v20  ;;  %v2314_v35 = vsub.f32 %v3051_v9, %v722_v47  ;;  %v909_v18 = vsel %vm481_vm0, %v817_v4, 0.0  ;;  %v912_v62 = vsel %vm481_vm0, %v818_v52, 0.0  ;;  %v3053_v20 = vld [vmem:[#allocation7_spill] sm:$0xff]  ;;  %v3054_v47 = vld [vmem:[#allocation10_spill] sm:$0xff] }
 0x1cd   :  { %v520_v0 = vpop.xlane.xlu0 %519  ;;  %v523_v56 = vpop.xlane.xlu1 %522  ;;  %910 = vadd.xlane.f32.xlu0 %v909_v18  ;;  %991 = vadd.xlane.f32.xlu1 %v990_v7 }
 0x1ce   :  { %3052 = vst [vmem:[#allocation6_spill] sm:$0xff] %v2314_v35  ;;  %v687_v12 = vmul.f32 0.03125, %v520_v0  ;;  %v688_v43 = vmul.f32 0.03125, %v523_v56  ;;  %v849_v40 = vmul.f32 %v2311_v11, %v2311_v11  ;;  %v850_v41 = vmul.f32 %v2314_v35, %v2314_v35 }
 0x1d0   :  { %v2322_v5 = vsub.f32 %v3053_v20, %v687_v12  ;;  %v2325_v9 = vsub.f32 %v3054_v47, %v688_v43  ;;  %v1005_v4 = vsel %vm481_vm0, %v849_v40, 0.0  ;;  %v1008_v47 = vsel %vm481_vm0, %v850_v41, 0.0 }
 0x1d1   :  { %v616_v18 = vpop.xlane.xlu0 %615  ;;  %v619_v7 = vpop.xlane.xlu1 %618  ;;  %1006 = vadd.xlane.f32.xlu0 %v1005_v4  ;;  %913 = vadd.xlane.f32.xlu1 %v912_v62 }
 0x1d2   :  { %3055 = vst [vmem:[#allocation9_spill] sm:$0xff] %v2325_v9  ;;  %v719_v0 = vmul.f32 0.03125, %v616_v18  ;;  %v720_v56 = vmul.f32 0.03125, %v619_v7  ;;  %v815_v52 = vmul.f32 %v2322_v5, %v2322_v5  ;;  %v816_v12 = vmul.f32 %v2325_v9, %v2325_v9 }
 0x1d4   :  { %v2335_v43 = vsub.f32 %v1983_v17, %v719_v0  ;;  %v2338_v40 = vsub.f32 %v1991_v21, %v720_v56  ;;  %v903_v20 = vsel %vm481_vm0, %v815_v52, 0.0  ;;  %v906_v9 = vsel %vm481_vm0, %v816_v12, 0.0 }
 0x1d5   :  { %v538_v4 = vpop.xlane.xlu0 %537  ;;  %v541_v62 = vpop.xlane.xlu1 %540  ;;  %904 = vadd.xlane.f32.xlu0 %v903_v20  ;;  %1009 = vadd.xlane.f32.xlu1 %v1008_v47 }
 0x1d6   :  { %v693_v18 = vmul.f32 0.03125, %v538_v4  ;;  %v694_v7 = vmul.f32 0.03125, %v541_v62  ;;  %v847_v35 = vmul.f32 %v2335_v43, %v2335_v43  ;;  %v848_v41 = vmul.f32 %v2338_v40, %v2338_v40 }
 0x1d8   :  { %v2346_v17 = vsub.f32 %v1997_v24, %v693_v18  ;;  %v2349_v21 = vsub.f32 %v2009_v30, %v694_v7  ;;  %v999_v0 = vsel %vm481_vm0, %v847_v35, 0.0  ;;  %v1002_v62 = vsel %vm481_vm0, %v848_v41, 0.0 }
 0x1d9   :  { %v634_v56 = vpop.xlane.xlu0 %633  ;;  %v637_v52 = vpop.xlane.xlu1 %636  ;;  %1000 = vadd.xlane.f32.xlu0 %v999_v0  ;;  %907 = vadd.xlane.f32.xlu1 %v906_v9 }
 0x1da   :  { %v725_v20 = vmul.f32 0.03125, %v634_v56  ;;  %v726_v47 = vmul.f32 0.03125, %v637_v52  ;;  %v821_v12 = vmul.f32 %v2346_v17, %v2346_v17  ;;  %v822_v24 = vmul.f32 %v2349_v21, %v2349_v21 }
 0x1dc   :  { %v2359_v30 = vsub.f32 %v1999_v25, %v725_v20  ;;  %v2362_v35 = vsub.f32 %v2011_v31, %v726_v47  ;;  %v921_v4 = vsel %vm481_vm0, %v821_v12, 0.0  ;;  %v924_v52 = vsel %vm481_vm0, %v822_v24, 0.0 }
 0x1dd   :  { %v532_v18 = vpop.xlane.xlu0 %531  ;;  %v535_v9 = vpop.xlane.xlu1 %534  ;;  %922 = vadd.xlane.f32.xlu0 %v921_v4  ;;  %1003 = vadd.xlane.f32.xlu1 %v1002_v62 }
 0x1de   :  { %v691_v7 = vmul.f32 0.03125, %v532_v18  ;;  %v692_v0 = vmul.f32 0.03125, %v535_v9  ;;  %v853_v56 = vmul.f32 %v2359_v30, %v2359_v30  ;;  %v854_v41 = vmul.f32 %v2362_v35, %v2362_v35 }
 0x1e0   :  { %v2370_v25 = vsub.f32 %v2005_v28, %v691_v7  ;;  %v2373_v31 = vsub.f32 %v2013_v32, %v692_v0  ;;  %v1017_v20 = vsel %vm481_vm0, %v853_v56, 0.0  ;;  %v1020_v7 = vsel %vm481_vm0, %v854_v41, 0.0 }
 0x1e1   :  { %v628_v47 = vpop.xlane.xlu0 %627  ;;  %v631_v12 = vpop.xlane.xlu1 %630  ;;  %1018 = vadd.xlane.f32.xlu0 %v1017_v20  ;;  %925 = vadd.xlane.f32.xlu1 %v924_v52 }
 0x1e2   :  { %v723_v4 = vmul.f32 0.03125, %v628_v47  ;;  %v724_v62 = vmul.f32 0.03125, %v631_v12  ;;  %v819_v24 = vmul.f32 %v2370_v25, %v2370_v25  ;;  %v820_v28 = vmul.f32 %v2373_v31, %v2373_v31 }
 0x1e4   :  { %v2383_v32 = vsub.f32 %v2007_v29, %v723_v4  ;;  %v2386_v18 = vsub.f32 %v2015_v33, %v724_v62  ;;  %v915_v9 = vsel %vm481_vm0, %v819_v24, 0.0  ;;  %v918_v12 = vsel %vm481_vm0, %v820_v28, 0.0 }
 0x1e5   :  { %v550_v0 = vpop.xlane.xlu0 %549  ;;  %v553_v56 = vpop.xlane.xlu1 %552  ;;  %916 = vadd.xlane.f32.xlu0 %v915_v9  ;;  %1021 = vadd.xlane.f32.xlu1 %v1020_v7 }
 0x1e6   :  { %v697_v52 = vmul.f32 0.03125, %v550_v0  ;;  %v698_v20 = vmul.f32 0.03125, %v553_v56  ;;  %v851_v47 = vmul.f32 %v2383_v32, %v2383_v32  ;;  %v852_v41 = vmul.f32 %v2386_v18, %v2386_v18 }
 0x1e8   :  { %v2394_v29 = vsub.f32 %v2021_v36, %v697_v52  ;;  %v2397_v33 = vsub.f32 %v2033_v50, %v698_v20  ;;  %v1011_v4 = vsel %vm481_vm0, %v851_v47, 0.0  ;;  %v1014_v52 = vsel %vm481_vm0, %v852_v41, 0.0 }
 0x1e9   :  { %v646_v62 = vpop.xlane.xlu0 %645  ;;  %v649_v24 = vpop.xlane.xlu1 %648  ;;  %1012 = vadd.xlane.f32.xlu0 %v1011_v4  ;;  %919 = vadd.xlane.f32.xlu1 %v918_v12 }
 0x1ea   :  { %v729_v9 = vmul.f32 0.03125, %v646_v62  ;;  %v730_v7 = vmul.f32 0.03125, %v649_v24  ;;  %v825_v28 = vmul.f32 %v2394_v29, %v2394_v29  ;;  %v826_v36 = vmul.f32 %v2397_v33, %v2397_v33 }
 0x1ec   :  { %v2407_v50 = vsub.f32 %v2023_v37, %v729_v9  ;;  %v2410_v0 = vsub.f32 %v2035_v51, %v730_v7  ;;  %v933_v56 = vsel %vm481_vm0, %v825_v28, 0.0  ;;  %v936_v24 = vsel %vm481_vm0, %v826_v36, 0.0 }
 0x1ed   :  { %v544_v20 = vpop.xlane.xlu0 %543  ;;  %v547_v47 = vpop.xlane.xlu1 %546  ;;  %934 = vadd.xlane.f32.xlu0 %v933_v56  ;;  %1015 = vadd.xlane.f32.xlu1 %v1014_v52 }
 0x1ee   :  { %v695_v12 = vmul.f32 0.03125, %v544_v20  ;;  %v696_v4 = vmul.f32 0.03125, %v547_v47  ;;  %v857_v62 = vmul.f32 %v2407_v50, %v2407_v50  ;;  %v858_v41 = vmul.f32 %v2410_v0, %v2410_v0 }
 0x1f0   :  { %v2418_v37 = vsub.f32 %v2029_v44, %v695_v12  ;;  %v2421_v51 = vsub.f32 %v2037_v54, %v696_v4  ;;  %v1029_v9 = vsel %vm481_vm0, %v857_v62, 0.0  ;;  %v1032_v12 = vsel %vm481_vm0, %v858_v41, 0.0 }
 0x1f1   :  { %v640_v7 = vpop.xlane.xlu0 %639  ;;  %v643_v28 = vpop.xlane.xlu1 %642  ;;  %1030 = vadd.xlane.f32.xlu0 %v1029_v9  ;;  %937 = vadd.xlane.f32.xlu1 %v936_v24 }
 0x1f2   :  { %v727_v56 = vmul.f32 0.03125, %v640_v7  ;;  %v728_v52 = vmul.f32 0.03125, %v643_v28  ;;  %v823_v36 = vmul.f32 %v2418_v37, %v2418_v37  ;;  %v824_v44 = vmul.f32 %v2421_v51, %v2421_v51 }
 0x1f4   :  { %v2431_v54 = vsub.f32 %v2031_v45, %v727_v56  ;;  %v2434_v20 = vsub.f32 %v2039_v55, %v728_v52  ;;  %v927_v47 = vsel %vm481_vm0, %v823_v36, 0.0  ;;  %v930_v28 = vsel %vm481_vm0, %v824_v44, 0.0 }
 0x1f5   :  { %v562_v4 = vpop.xlane.xlu0 %561  ;;  %v565_v62 = vpop.xlane.xlu1 %564  ;;  %928 = vadd.xlane.f32.xlu0 %v927_v47  ;;  %1033 = vadd.xlane.f32.xlu1 %v1032_v12 }
 0x1f6   :  { %v701_v24 = vmul.f32 0.03125, %v562_v4  ;;  %v702_v9 = vmul.f32 0.03125, %v565_v62  ;;  %v855_v7 = vmul.f32 %v2431_v54, %v2431_v54  ;;  %v856_v41 = vmul.f32 %v2434_v20, %v2434_v20 }
 0x1f8   :  { %v2442_v45 = vsub.f32 %v2045_v2, %v701_v24  ;;  %v2445_v55 = vsub.f32 %v2057_v22, %v702_v9  ;;  %v1023_v56 = vsel %vm481_vm0, %v855_v7, 0.0  ;;  %v1026_v24 = vsel %vm481_vm0, %v856_v41, 0.0 }
 0x1f9   :  { %v658_v52 = vpop.xlane.xlu0 %657  ;;  %v661_v36 = vpop.xlane.xlu1 %660  ;;  %1024 = vadd.xlane.f32.xlu0 %v1023_v56  ;;  %931 = vadd.xlane.f32.xlu1 %v930_v28 }
 0x1fa   :  { %v733_v47 = vmul.f32 0.03125, %v658_v52  ;;  %v734_v12 = vmul.f32 0.03125, %v661_v36  ;;  %v829_v44 = vmul.f32 %v2442_v45, %v2442_v45  ;;  %v830_v2 = vmul.f32 %v2445_v55, %v2445_v55 }
 0x1fc   :  { %v2455_v22 = vsub.f32 %v2047_v3, %v733_v47  ;;  %v2458_v4 = vsub.f32 %v2059_v23, %v734_v12  ;;  %v945_v62 = vsel %vm481_vm0, %v829_v44, 0.0  ;;  %v948_v36 = vsel %vm481_vm0, %v830_v2, 0.0 }
 0x1fd   :  { %v556_v9 = vpop.xlane.xlu0 %555  ;;  %v559_v7 = vpop.xlane.xlu1 %558  ;;  %946 = vadd.xlane.f32.xlu0 %v945_v62  ;;  %1027 = vadd.xlane.f32.xlu1 %v1026_v24 }
 0x1fe   :  { %3056 = vst [vmem:[#allocation7_spill] sm:$0xff] %v2458_v4  ;;  %v699_v28 = vmul.f32 0.03125, %v556_v9  ;;  %v700_v56 = vmul.f32 0.03125, %v559_v7  ;;  %v861_v52 = vmul.f32 %v2455_v22, %v2455_v22  ;;  %v862_v41 = vmul.f32 %v2458_v4, %v2458_v4 }
 0x200   :  { %v2466_v3 = vsub.f32 %v2053_v14, %v699_v28  ;;  %v2469_v23 = vsub.f32 %v2061_v26, %v700_v56  ;;  %v1041_v47 = vsel %vm481_vm0, %v861_v52, 0.0  ;;  %v1044_v28 = vsel %vm481_vm0, %v862_v41, 0.0 }
 0x201   :  { %v652_v12 = vpop.xlane.xlu0 %651  ;;  %v655_v44 = vpop.xlane.xlu1 %654  ;;  %1042 = vadd.xlane.f32.xlu0 %v1041_v47  ;;  %949 = vadd.xlane.f32.xlu1 %v948_v36 }
 0x202   :  { %3057 = vst [vmem:[#allocation10_spill] sm:$0xff] %v2469_v23  ;;  %v731_v62 = vmul.f32 0.03125, %v652_v12  ;;  %v732_v24 = vmul.f32 0.03125, %v655_v44  ;;  %v827_v2 = vmul.f32 %v2466_v3, %v2466_v3  ;;  %v828_v14 = vmul.f32 %v2469_v23, %v2469_v23  ;;  %v3064_v23 = vld [vmem:[#allocation13_spill] sm:$0xff] }
 0x204   :  { %v2479_v26 = vsub.f32 %v2055_v15, %v731_v62  ;;  %v2482_v9 = vsub.f32 %v2063_v27, %v732_v24  ;;  %v939_v7 = vsel %vm481_vm0, %v827_v2, 0.0  ;;  %v942_v44 = vsel %vm481_vm0, %v828_v14, 0.0  ;;  %v3060_v15 = vld [vmem:[#allocation11_spill] sm:$0xff] }
 0x205   :  { %v574_v56 = vpop.xlane.xlu0 %573  ;;  %940 = vadd.xlane.f32.xlu0 %v939_v7  ;;  %v577_v52 = vpop.xlane.xlu1 %576  ;;  %1045 = vadd.xlane.f32.xlu1 %v1044_v28  ;;  %v3062_v27 = vld [vmem:[#allocation15_spill] sm:$0xff] }
 0x206   :  { %3058 = vst [vmem:[#allocation22_spill] sm:$0xff] %v2479_v26  ;;  %3059 = vst [vmem:[#allocation23_spill] sm:$0xff] %v2482_v9  ;;  %v705_v36 = vmul.f32 0.03125, %v574_v56  ;;  %v706_v47 = vmul.f32 0.03125, %v577_v52  ;;  %v859_v12 = vmul.f32 %v2479_v26, %v2479_v26  ;;  %v860_v41 = vmul.f32 %v2482_v9, %v2482_v9  ;;  %v3066_v26 = vld [vmem:[#allocation17_spill] sm:$0xff] }
 0x208   :  { %v2490_v62 = vsub.f32 %v3060_v15, %v705_v36  ;;  %v2493_v24 = vsub.f32 %v3062_v27, %v706_v47  ;;  %v1035_v2 = vsel %vm481_vm0, %v859_v12, 0.0  ;;  %v1038_v52 = vsel %vm481_vm0, %v860_v41, 0.0 }
 0x209   :  { %v670_v7 = vpop.xlane.xlu0 %669  ;;  %1036 = vadd.xlane.f32.xlu0 %v1035_v2  ;;  %v673_v28 = vpop.xlane.xlu1 %672  ;;  %943 = vadd.xlane.f32.xlu1 %v942_v44 }
 0x20a   :  { %3061 = vst [vmem:[#allocation11_spill] sm:$0xff] %v2490_v62  ;;  %3063 = vst [vmem:[#allocation15_spill] sm:$0xff] %v2493_v24  ;;  %v833_v56 = vmul.f32 %v2490_v62, %v2490_v62  ;;  %v834_v36 = vmul.f32 %v2493_v24, %v2493_v24  ;;  %v737_v9 = vmul.f32 0.03125, %v670_v7  ;;  %v738_v2 = vmul.f32 0.03125, %v673_v28  ;;  %v3068_v28 = vld [vmem:[#allocation12_spill] sm:$0xff] }
 0x20c   :  { %v957_v14 = vsel %vm481_vm0, %v833_v56, 0.0  ;;  %v960_v56 = vsel %vm481_vm0, %v834_v36, 0.0 }
 0x20d   :  { %958 = vadd.xlane.f32.xlu0 %v957_v14  ;;  %v568_v47 = vpop.xlane.xlu0 %567  ;;  %1039 = vadd.xlane.f32.xlu1 %v1038_v52  ;;  %v571_v12 = vpop.xlane.xlu1 %570 }
 0x20e   :  { %v703_v15 = vmul.f32 0.03125, %v568_v47  ;;  %v704_v27 = vmul.f32 0.03125, %v571_v12  ;;  %v2516_v47 = vsub.f32 %v3068_v28, %v737_v9 }
 0x210   :  { %v2505_v44 = vsub.f32 %v3064_v23, %v703_v15  ;;  %v2508_v62 = vsub.f32 %v3066_v26, %v704_v27  ;;  %3069 = vst [vmem:[#allocation12_spill] sm:$0xff] %v2516_v47  ;;  %v3070_v23 = vld [vmem:[#allocation16_spill] sm:$0xff]  ;;  %v3072_v26 = vld [vmem:[#allocation14_spill] sm:$0xff] }
 0x211   :  { %v664_v41 = vpop.xlane.xlu0 %663  ;;  %961 = vadd.xlane.f32.xlu1 %v960_v56  ;;  %v667_v4 = vpop.xlane.xlu1 %666  ;;  %v2519_v12 = vsub.f32 %v3070_v23, %v738_v2 }
 0x212   :  { %3065 = vst [vmem:[#allocation13_spill] sm:$0xff] %v2505_v44  ;;  %3067 = vst [vmem:[#allocation17_spill] sm:$0xff] %v2508_v62  ;;  %v735_v24 = vmul.f32 0.03125, %v664_v41  ;;  %v736_v14 = vmul.f32 0.03125, %v667_v4  ;;  %v831_v52 = vmul.f32 %v2505_v44, %v2505_v44  ;;  %v832_v7 = vmul.f32 %v2508_v62, %v2508_v62 }
 0x213   :  { %3071 = vst [vmem:[#allocation16_spill] sm:$0xff] %v2519_v12  ;;  %v866_v41 = vmul.f32 %v2519_v12, %v2519_v12 }
 0x214   :  { %v2522_v15 = vsub.f32 %v3072_v26, %v735_v24  ;;  %v2525_v36 = vsub.f32 %v2087_v19, %v736_v14  ;;  %v951_v4 = vsel %vm481_vm0, %v831_v52, 0.0  ;;  %v954_v27 = vsel %vm481_vm0, %v832_v7, 0.0 }
 0x215   :  { %952 = vadd.xlane.f32.xlu0 %v951_v4  ;;  %955 = vadd.xlane.f32.xlu1 %v954_v27  ;;  %v865_v19 = vmul.f32 %v2516_v47, %v2516_v47  ;;  %v1056_v52 = vsel %vm481_vm0, %v866_v41, 0.0 }
 0x216   :  { %3073 = vst [vmem:[#allocation14_spill] sm:$0xff] %v2522_v15  ;;  %3074 = vst [vmem:[#allocation24_spill] sm:$0xff] %v2525_v36  ;;  %v863_v56 = vmul.f32 %v2522_v15, %v2522_v15  ;;  %v864_v9 = vmul.f32 %v2525_v36, %v2525_v36 }
 0x217   :  { %v1053_v14 = vsel %vm481_vm0, %v865_v19, 0.0 }
 0x218   :  { %v1047_v2 = vsel %vm481_vm0, %v863_v56, 0.0  ;;  %v1050_v24 = vsel %vm481_vm0, %v864_v9, 0.0 }
 0x219   :  { %1048 = vadd.xlane.f32.xlu0 %v1047_v2  ;;  %1051 = vadd.xlane.f32.xlu1 %v1050_v24 }
 0x21d   :  { %1054 = vadd.xlane.f32.xlu0 %v1053_v14  ;;  %1057 = vadd.xlane.f32.xlu1 %v1056_v52 }
 0x22a   :  { %v875_v7 = vpop.xlane.xlu0 %874 }
 0x22b   :  { %v1061_v28 = vmul.f32 0.03125, %v875_v7 }
 0x22d   :  { %v1125_v23 = vadd.f32 1e-05, %v1061_v28 }
 0x22e   :  { %v971_v26 = vpop.xlane.xlu0 %970  ;;  %v878_v4 = vpop.xlane.xlu1 %877 }
 0x22f   :  { %1683 = vrsqrt.f32 %v1125_v23  ;;  %v1093_v27 = vmul.f32 0.03125, %v971_v26  ;;  %v1062_v56 = vmul.f32 0.03125, %v878_v4  ;;  %v2544_v23 = vld [vmem:[%s2993_s2] ss:$0 sm:$0xff] }
 0x231   :  { %v1157_v9 = vadd.f32 1e-05, %v1093_v27  ;;  %v1126_v47 = vadd.f32 1e-05, %v1062_v56  ;;  %v2550_v27 = vld [vmem:[%s2994_s3] ss:$0 sm:$0xff] }
 0x232   :  { %v869_v36 = vpop.xlane.xlu0 %868  ;;  %v974_v12 = vpop.xlane.xlu1 %973 }
 0x233   :  { %1685 = vrsqrt.f32 %v1157_v9  ;;  %v1059_v2 = vmul.f32 0.03125, %v869_v36  ;;  %v1094_v24 = vmul.f32 0.03125, %v974_v12 }
 0x234   :  { %1687 = vrsqrt.f32 %v1126_v47 }
 0x235   :  { %v1123_v19 = vadd.f32 1e-05, %v1059_v2  ;;  %v1158_v41 = vadd.f32 1e-05, %v1094_v24 }
 0x236   :  { %v965_v14 = vpop.xlane.xlu0 %964  ;;  %v872_v52 = vpop.xlane.xlu1 %871 }
 0x237   :  { %1689 = vrsqrt.f32 %v1123_v19  ;;  %v1091_v7 = vmul.f32 0.03125, %v965_v14  ;;  %v1060_v28 = vmul.f32 0.03125, %v872_v52 }
 0x238   :  { %1691 = vrsqrt.f32 %v1158_v41 }
 0x239   :  { %v1684_v15 = vpop.eup %1683  ;;  %v1155_v26 = vadd.f32 1e-05, %v1091_v7  ;;  %v1124_v4 = vadd.f32 1e-05, %v1060_v28 }
 0x23a   :  { %v1253_v36 = vmul.f32 %v1684_v15, %v2161_v10  ;;  %v887_v12 = vpop.xlane.xlu0 %886  ;;  %v968_v47 = vpop.xlane.xlu1 %967  ;;  %v3075_v10 = vld [vmem:[#allocation18_spill] sm:$0xff] }
 0x23b   :  { %1693 = vrsqrt.f32 %v1155_v26  ;;  %v1065_v56 = vmul.f32 0.03125, %v887_v12  ;;  %v1092_v9 = vmul.f32 0.03125, %v968_v47 }
 0x23c   :  { %v1324_v2 = vmul.f32 %v2544_v23, %v1253_v36  ;;  %1695 = vrsqrt.f32 %v1124_v4 }
 0x23d   :  { %v1686_v24 = vpop.eup %1685  ;;  %v1129_v19 = vadd.f32 1e-05, %v1065_v56  ;;  %v1156_v41 = vadd.f32 1e-05, %v1092_v9 }
 0x23e   :  { %v1688_v14 = vpop.eup %1687  ;;  %v1395_v52 = vadd.f32 %v2550_v27, %v1324_v2  ;;  %v1285_v15 = vmul.f32 %v1686_v24, %v3075_v10  ;;  %v983_v7 = vpop.xlane.xlu0 %982 }
 0x23f   :  { %v890_v28 = vpop.xlane.xlu1 %889  ;;  %v1254_v62 = vmul.f32 %v1688_v14, %v2171_v39  ;;  %1697 = vrsqrt.f32 %v1129_v19  ;;  %v1097_v44 = vmul.f32 0.03125, %v983_v7 }
 0x240   :  { %v1066_v26 = vmul.f32 0.03125, %v890_v28  ;;  %1459 = vst.msk [vmem:[%s2995_s4 + $0x10] sm:$0xff] %vm481_vm0, %v1395_v52  ;;  %v1356_v4 = vmul.f32 %v2544_v23, %v1285_v15  ;;  %1699 = vrsqrt.f32 %v1156_v41  ;;  %v3076_v28 = vld [vmem:[#allocation19_spill] sm:$0xff] }
 0x241   :  { %v1690_v36 = vpop.eup %1689  ;;  %v1325_v12 = vmul.f32 %v2544_v23, %v1254_v62  ;;  %v1161_v47 = vadd.f32 1e-05, %v1097_v44 }
 0x242   :  { %v1130_v56 = vadd.f32 1e-05, %v1066_v26  ;;  %v1692_v9 = vpop.eup %1691  ;;  %v1427_v2 = vadd.f32 %v2550_v27, %v1356_v4  ;;  %v1251_v39 = vmul.f32 %v1690_v36, %v2168_v63  ;;  %v881_v24 = vpop.xlane.xlu0 %880 }
 0x243   :  { %v986_v19 = vpop.xlane.xlu1 %985  ;;  %v1396_v14 = vadd.f32 %v2550_v27, %v1325_v12  ;;  %v1286_v10 = vmul.f32 %v1692_v9, %v2181_v42  ;;  %1701 = vrsqrt.f32 %v1161_v47  ;;  %v1063_v52 = vmul.f32 0.03125, %v881_v24 }
 0x244   :  { %1491 = vst.msk [vmem:[%s2995_s4 + $0x110] sm:$0xff] %vm481_vm0, %v1427_v2  ;;  %v1322_v62 = vmul.f32 %v2544_v23, %v1251_v39  ;;  %1703 = vrsqrt.f32 %v1130_v56  ;;  %v1098_v44 = vmul.f32 0.03125, %v986_v19 }
 0x245   :  { %v1694_v41 = vpop.eup %1693  ;;  %1460 = vst.msk [vmem:[%s2995_s4 + $0x18] sm:$0xff] %vm481_vm0, %v1396_v14  ;;  %v1357_v63 = vmul.f32 %v2544_v23, %v1286_v10  ;;  %v1127_v42 = vadd.f32 1e-05, %v1063_v52 }
 0x246   :  { %v1696_v15 = vpop.eup %1695  ;;  %v1393_v7 = vadd.f32 %v2550_v27, %v1322_v62  ;;  %v1283_v26 = vmul.f32 %v1694_v41, %v3076_v28  ;;  %v1162_v4 = vadd.f32 1e-05, %v1098_v44  ;;  %v977_v36 = vpop.xlane.xlu0 %976 }
 0x247   :  { %v884_v12 = vpop.xlane.xlu1 %883  ;;  %v1428_v47 = vadd.f32 %v2550_v27, %v1357_v63  ;;  %v1252_v56 = vmul.f32 %v1696_v15, %v2194_v34  ;;  %1705 = vrsqrt.f32 %v1127_v42  ;;  %v1095_v9 = vmul.f32 0.03125, %v977_v36 }
 0x248   :  { %1457 = vst.msk [vmem:[%s2995_s4] sm:$0xff] %vm481_vm0, %v1393_v7  ;;  %v1354_v2 = vmul.f32 %v2544_v23, %v1283_v26  ;;  %1707 = vrsqrt.f32 %v1162_v4  ;;  %v1064_v39 = vmul.f32 0.03125, %v884_v12 }
 0x249   :  { %v1698_v24 = vpop.eup %1697  ;;  %1492 = vst.msk [vmem:[%s2995_s4 + $0x118] sm:$0xff] %vm481_vm0, %v1428_v47  ;;  %v1323_v19 = vmul.f32 %v2544_v23, %v1252_v56  ;;  %v1159_v34 = vadd.f32 1e-05, %v1095_v9 }
 0x24a   :  { %v1700_v14 = vpop.eup %1699  ;;  %v1425_v10 = vadd.f32 %v2550_v27, %v1354_v2  ;;  %v1257_v52 = vmul.f32 %v1698_v24, %v2202_v49  ;;  %v1128_v62 = vadd.f32 1e-05, %v1064_v39  ;;  %v899_v44 = vpop.xlane.xlu0 %898 }
 0x24b   :  { %v980_v41 = vpop.xlane.xlu1 %979  ;;  %v1394_v63 = vadd.f32 %v2550_v27, %v1323_v19  ;;  %v1284_v42 = vmul.f32 %v1700_v14, %v2191_v46  ;;  %1709 = vrsqrt.f32 %v1159_v34  ;;  %v1069_v15 = vmul.f32 0.03125, %v899_v44 }
 0x24c   :  { %1489 = vst.msk [vmem:[%s2995_s4 + $0x100] sm:$0xff] %vm481_vm0, %v1425_v10  ;;  %v1328_v7 = vmul.f32 %v2544_v23, %v1257_v52  ;;  %1711 = vrsqrt.f32 %v1128_v62  ;;  %v1096_v28 = vmul.f32 0.03125, %v980_v41 }
 0x24d   :  { %v1702_v26 = vpop.eup %1701  ;;  %1458 = vst.msk [vmem:[%s2995_s4 + $0x8] sm:$0xff] %vm481_vm0, %v1394_v63  ;;  %v1355_v49 = vmul.f32 %v2544_v23, %v1284_v42  ;;  %v1133_v46 = vadd.f32 1e-05, %v1069_v15 }
 0x24e   :  { %v1704_v4 = vpop.eup %1703  ;;  %v1399_v36 = vadd.f32 %v2550_v27, %v1328_v7  ;;  %v1289_v12 = vmul.f32 %v1702_v26, %v2215_v58  ;;  %v1160_v47 = vadd.f32 1e-05, %v1096_v28  ;;  %v995_v56 = vpop.xlane.xlu0 %994 }
 0x24f   :  { %v902_v9 = vpop.xlane.xlu1 %901  ;;  %v1426_v2 = vadd.f32 %v2550_v27, %v1355_v49  ;;  %v1258_v39 = vmul.f32 %v1704_v4, %v2205_v48  ;;  %1713 = vrsqrt.f32 %v1133_v46  ;;  %v1101_v24 = vmul.f32 0.03125, %v995_v56 }
 0x250   :  { %1463 = vst.msk [vmem:[%s2995_s4 + $0x30] sm:$0xff] %vm481_vm0, %v1399_v36  ;;  %v1360_v19 = vmul.f32 %v2544_v23, %v1289_v12  ;;  %1715 = vrsqrt.f32 %v1160_v47  ;;  %v1070_v34 = vmul.f32 0.03125, %v902_v9 }
 0x251   :  { %v1706_v14 = vpop.eup %1705  ;;  %1490 = vst.msk [vmem:[%s2995_s4 + $0x108] sm:$0xff] %vm481_vm0, %v1426_v2  ;;  %v1329_v58 = vmul.f32 %v2544_v23, %v1258_v39  ;;  %v1165_v48 = vadd.f32 1e-05, %v1101_v24 }
 0x252   :  { %v1708_v10 = vpop.eup %1707  ;;  %v1431_v52 = vadd.f32 %v2550_v27, %v1360_v19  ;;  %v1255_v62 = vmul.f32 %v1706_v14, %v2226_v53  ;;  %v1134_v44 = vadd.f32 1e-05, %v1070_v34  ;;  %v893_v41 = vpop.xlane.xlu0 %892 }
 0x253   :  { %v998_v63 = vpop.xlane.xlu1 %997  ;;  %v1400_v42 = vadd.f32 %v2550_v27, %v1329_v58  ;;  %v1290_v15 = vmul.f32 %v1708_v10, %v2218_v16  ;;  %1717 = vrsqrt.f32 %v1165_v48  ;;  %v1067_v7 = vmul.f32 0.03125, %v893_v41 }
 0x254   :  { %1495 = vst.msk [vmem:[%s2995_s4 + $0x130] sm:$0xff] %vm481_vm0, %v1431_v52  ;;  %v1326_v28 = vmul.f32 %v2544_v23, %v1255_v62  ;;  %1719 = vrsqrt.f32 %v1134_v44  ;;  %v1102_v26 = vmul.f32 0.03125, %v998_v63 }
 0x255   :  { %v1710_v49 = vpop.eup %1709  ;;  %1464 = vst.msk [vmem:[%s2995_s4 + $0x38] sm:$0xff] %vm481_vm0, %v1400_v42  ;;  %v1361_v53 = vmul.f32 %v2544_v23, %v1290_v15  ;;  %v1131_v16 = vadd.f32 1e-05, %v1067_v7 }
 0x256   :  { %v1712_v46 = vpop.eup %1711  ;;  %v1397_v4 = vadd.f32 %v2550_v27, %v1326_v28  ;;  %v1287_v36 = vmul.f32 %v1710_v49, %v2239_v60  ;;  %v1166_v12 = vadd.f32 1e-05, %v1102_v26  ;;  %v989_v47 = vpop.xlane.xlu0 %988 }
 0x257   :  { %v896_v56 = vpop.xlane.xlu1 %895  ;;  %v1432_v9 = vadd.f32 %v2550_v27, %v1361_v53  ;;  %v1256_v2 = vmul.f32 %v1712_v46, %v2229_v59  ;;  %1721 = vrsqrt.f32 %v1131_v16  ;;  %v1099_v39 = vmul.f32 0.03125, %v989_v47 }
 0x258   :  { %1461 = vst.msk [vmem:[%s2995_s4 + $0x20] sm:$0xff] %vm481_vm0, %v1397_v4  ;;  %v1358_v24 = vmul.f32 %v2544_v23, %v1287_v36  ;;  %1723 = vrsqrt.f32 %v1166_v12  ;;  %v1068_v19 = vmul.f32 0.03125, %v896_v56 }
 0x259   :  { %v1714_v34 = vpop.eup %1713  ;;  %1496 = vst.msk [vmem:[%s2995_s4 + $0x138] sm:$0xff] %vm481_vm0, %v1432_v9  ;;  %v1327_v60 = vmul.f32 %v2544_v23, %v1256_v2  ;;  %v1163_v59 = vadd.f32 1e-05, %v1099_v39 }
 0x25a   :  { %v1716_v14 = vpop.eup %1715  ;;  %v1429_v58 = vadd.f32 %v2550_v27, %v1358_v24  ;;  %v1261_v48 = vmul.f32 %v1714_v34, %v2250_v57  ;;  %v1132_v10 = vadd.f32 1e-05, %v1068_v19  ;;  %v911_v52 = vpop.xlane.xlu0 %910 }
 0x25b   :  { %v992_v62 = vpop.xlane.xlu1 %991  ;;  %v1398_v44 = vadd.f32 %v2550_v27, %v1327_v60  ;;  %v1288_v41 = vmul.f32 %v1716_v14, %v2242_v13  ;;  %1725 = vrsqrt.f32 %v1163_v59  ;;  %v1073_v63 = vmul.f32 0.03125, %v911_v52 }
 0x25c   :  { %1493 = vst.msk [vmem:[%s2995_s4 + $0x120] sm:$0xff] %vm481_vm0, %v1429_v58  ;;  %v1332_v42 = vmul.f32 %v2544_v23, %v1261_v48  ;;  %1727 = vrsqrt.f32 %v1132_v10  ;;  %v1100_v15 = vmul.f32 0.03125, %v992_v62 }
 0x25d   :  { %v1718_v7 = vpop.eup %1717  ;;  %1462 = vst.msk [vmem:[%s2995_s4 + $0x28] sm:$0xff] %vm481_vm0, %v1398_v44  ;;  %v1359_v57 = vmul.f32 %v2544_v23, %v1288_v41  ;;  %v1137_v13 = vadd.f32 1e-05, %v1073_v63 }
 0x25e   :  { %v1720_v28 = vpop.eup %1719  ;;  %v1403_v26 = vadd.f32 %v2550_v27, %v1332_v42  ;;  %v1293_v49 = vmul.f32 %v1718_v7, %v2263_v6  ;;  %v1164_v53 = vadd.f32 1e-05, %v1100_v15  ;;  %v1007_v16 = vpop.xlane.xlu0 %1006 }
 0x25f   :  { %v914_v46 = vpop.xlane.xlu1 %913  ;;  %v1430_v4 = vadd.f32 %v2550_v27, %v1359_v57  ;;  %v1262_v36 = vmul.f32 %v1720_v28, %v2253_v61  ;;  %1729 = vrsqrt.f32 %v1137_v13  ;;  %v1105_v12 = vmul.f32 0.03125, %v1007_v16  ;;  %v3077_v57 = vld [vmem:[#allocation20_spill] sm:$0xff] }
 0x260   :  { %1467 = vst.msk [vmem:[%s2995_s4 + $0x50] sm:$0xff] %vm481_vm0, %v1403_v26  ;;  %v1364_v47 = vmul.f32 %v2544_v23, %v1293_v49  ;;  %1731 = vrsqrt.f32 %v1164_v53  ;;  %v1074_v56 = vmul.f32 0.03125, %v914_v46 }
 0x261   :  { %v1722_v9 = vpop.eup %1721  ;;  %1494 = vst.msk [vmem:[%s2995_s4 + $0x128] sm:$0xff] %vm481_vm0, %v1430_v4  ;;  %v1333_v6 = vmul.f32 %v2544_v23, %v1262_v36  ;;  %v1169_v61 = vadd.f32 1e-05, %v1105_v12  ;;  %v3078_v36 = vld [vmem:[#allocation5_spill] sm:$0xff] }
 0x262   :  { %v1724_v2 = vpop.eup %1723  ;;  %v1435_v39 = vadd.f32 %v2550_v27, %v1364_v47  ;;  %v1259_v24 = vmul.f32 %v1722_v9, %v2274_v1  ;;  %v1138_v19 = vadd.f32 1e-05, %v1074_v56  ;;  %v905_v34 = vpop.xlane.xlu0 %904 }
 0x263   :  { %v1010_v60 = vpop.xlane.xlu1 %1009  ;;  %v1404_v59 = vadd.f32 %v2550_v27, %v1333_v6  ;;  %v1294_v14 = vmul.f32 %v1724_v2, %v2266_v38  ;;  %1733 = vrsqrt.f32 %v1169_v61  ;;  %v1071_v58 = vmul.f32 0.03125, %v905_v34  ;;  %v3079_v61 = vld [vmem:[#allocation21_spill] sm:$0xff] }
 0x264   :  { %1499 = vst.msk [vmem:[%s2995_s4 + $0x150] sm:$0xff] %vm481_vm0, %v1435_v39  ;;  %v1330_v48 = vmul.f32 %v2544_v23, %v1259_v24  ;;  %1735 = vrsqrt.f32 %v1138_v19  ;;  %v1106_v10 = vmul.f32 0.03125, %v1010_v60 }
 0x265   :  { %v1726_v52 = vpop.eup %1725  ;;  %1468 = vst.msk [vmem:[%s2995_s4 + $0x58] sm:$0xff] %vm481_vm0, %v1404_v59  ;;  %v1365_v1 = vmul.f32 %v2544_v23, %v1294_v14  ;;  %v1135_v38 = vadd.f32 1e-05, %v1071_v58 }
 0x266   :  { %v1728_v62 = vpop.eup %1727  ;;  %v1401_v44 = vadd.f32 %v2550_v27, %v1330_v48  ;;  %v1291_v41 = vmul.f32 %v1726_v52, %v2287_v8  ;;  %v1170_v63 = vadd.f32 1e-05, %v1106_v10  ;;  %v1001_v42 = vpop.xlane.xlu0 %1000 }
 0x267   :  { %v908_v15 = vpop.xlane.xlu1 %907  ;;  %v1436_v7 = vadd.f32 %v2550_v27, %v1365_v1  ;;  %v1260_v13 = vmul.f32 %v1728_v62, %v3077_v57  ;;  %1737 = vrsqrt.f32 %v1135_v38  ;;  %v1103_v28 = vmul.f32 0.03125, %v1001_v42  ;;  %v3080_v62 = vld [vmem:[#allocation8_spill] sm:$0xff] }
 0x268   :  { %1465 = vst.msk [vmem:[%s2995_s4 + $0x40] sm:$0xff] %vm481_vm0, %v1401_v44  ;;  %v1362_v26 = vmul.f32 %v2544_v23, %v1291_v41  ;;  %1739 = vrsqrt.f32 %v1170_v63  ;;  %v1072_v49 = vmul.f32 0.03125, %v908_v15 }
 0x269   :  { %v1730_v53 = vpop.eup %1729  ;;  %1500 = vst.msk [vmem:[%s2995_s4 + $0x158] sm:$0xff] %vm481_vm0, %v1436_v7  ;;  %v1331_v8 = vmul.f32 %v2544_v23, %v1260_v13  ;;  %v1167_v16 = vadd.f32 1e-05, %v1103_v28 }
 0x26a   :  { %v1732_v46 = vpop.eup %1731  ;;  %v1433_v4 = vadd.f32 %v2550_v27, %v1362_v26  ;;  %v1265_v12 = vmul.f32 %v1730_v53, %v3078_v36  ;;  %v1136_v47 = vadd.f32 1e-05, %v1072_v49  ;;  %v923_v56 = vpop.xlane.xlu0 %922 }
 0x26b   :  { %v1004_v9 = vpop.xlane.xlu1 %1003  ;;  %v1402_v6 = vadd.f32 %v2550_v27, %v1331_v8  ;;  %v1292_v2 = vmul.f32 %v1732_v46, %v3079_v61  ;;  %1741 = vrsqrt.f32 %v1167_v16  ;;  %v1077_v39 = vmul.f32 0.03125, %v923_v56  ;;  %v3081_v16 = vld [vmem:[#allocation6_spill] sm:$0xff] }
 0x26c   :  { %1497 = vst.msk [vmem:[%s2995_s4 + $0x140] sm:$0xff] %vm481_vm0, %v1433_v4  ;;  %v1336_v24 = vmul.f32 %v2544_v23, %v1265_v12  ;;  %1743 = vrsqrt.f32 %v1136_v47  ;;  %v1104_v19 = vmul.f32 0.03125, %v1004_v9 }
 0x26d   :  { %v1734_v34 = vpop.eup %1733  ;;  %1466 = vst.msk [vmem:[%s2995_s4 + $0x48] sm:$0xff] %vm481_vm0, %v1402_v6  ;;  %v1363_v60 = vmul.f32 %v2544_v23, %v1292_v2  ;;  %v1141_v59 = vadd.f32 1e-05, %v1077_v39 }
 0x26e   :  { %v1736_v14 = vpop.eup %1735  ;;  %v1407_v58 = vadd.f32 %v2550_v27, %v1336_v24  ;;  %v1297_v48 = vmul.f32 %v1734_v34, %v2311_v11  ;;  %v1168_v10 = vadd.f32 1e-05, %v1104_v19  ;;  %v1019_v52 = vpop.xlane.xlu0 %1018  ;;  %v3082_v34 = vld [vmem:[#allocation9_spill] sm:$0xff] }
 0x26f   :  { %v926_v1 = vpop.xlane.xlu1 %925  ;;  %v1434_v38 = vadd.f32 %v2550_v27, %v1363_v60  ;;  %v1266_v44 = vmul.f32 %v1736_v14, %v3080_v62  ;;  %1745 = vrsqrt.f32 %v1141_v59  ;;  %v1109_v41 = vmul.f32 0.03125, %v1019_v52 }
 0x270   :  { %1471 = vst.msk [vmem:[%s2995_s4 + $0x70] sm:$0xff] %vm481_vm0, %v1407_v58  ;;  %v1368_v63 = vmul.f32 %v2544_v23, %v1297_v48  ;;  %1747 = vrsqrt.f32 %v1168_v10  ;;  %v1078_v42 = vmul.f32 0.03125, %v926_v1 }
 0x271   :  { %v1738_v15 = vpop.eup %1737  ;;  %1498 = vst.msk [vmem:[%s2995_s4 + $0x148] sm:$0xff] %vm481_vm0, %v1434_v38  ;;  %v1337_v11 = vmul.f32 %v2544_v23, %v1266_v44  ;;  %v1173_v7 = vadd.f32 1e-05, %v1109_v41 }
 0x272   :  { %v1740_v57 = vpop.eup %1739  ;;  %v1439_v13 = vadd.f32 %v2550_v27, %v1368_v63  ;;  %v1263_v28 = vmul.f32 %v1738_v15, %v2322_v5  ;;  %v1142_v26 = vadd.f32 1e-05, %v1078_v42  ;;  %v917_v49 = vpop.xlane.xlu0 %916 }
 0x273   :  { %v1022_v53 = vpop.xlane.xlu1 %1021  ;;  %v1408_v8 = vadd.f32 %v2550_v27, %v1337_v11  ;;  %v1298_v46 = vmul.f32 %v1740_v57, %v3081_v16  ;;  %1749 = vrsqrt.f32 %v1173_v7  ;;  %v1075_v4 = vmul.f32 0.03125, %v917_v49 }
 0x274   :  { %1503 = vst.msk [vmem:[%s2995_s4 + $0x170] sm:$0xff] %vm481_vm0, %v1439_v13  ;;  %v1334_v36 = vmul.f32 %v2544_v23, %v1263_v28  ;;  %1751 = vrsqrt.f32 %v1142_v26  ;;  %v1110_v12 = vmul.f32 0.03125, %v1022_v53 }
 0x275   :  { %v1742_v47 = vpop.eup %1741  ;;  %1472 = vst.msk [vmem:[%s2995_s4 + $0x78] sm:$0xff] %vm481_vm0, %v1408_v8  ;;  %v1369_v5 = vmul.f32 %v2544_v23, %v1298_v46  ;;  %v1139_v56 = vadd.f32 1e-05, %v1075_v4 }
 0x276   :  { %v1744_v9 = vpop.eup %1743  ;;  %v1405_v6 = vadd.f32 %v2550_v27, %v1334_v36  ;;  %v1295_v61 = vmul.f32 %v1742_v47, %v2335_v43  ;;  %v1174_v2 = vadd.f32 1e-05, %v1110_v12  ;;  %v1013_v39 = vpop.xlane.xlu0 %1012 }
 0x277   :  { %v920_v24 = vpop.xlane.xlu1 %919  ;;  %v1440_v19 = vadd.f32 %v2550_v27, %v1369_v5  ;;  %v1264_v60 = vmul.f32 %v1744_v9, %v3082_v34  ;;  %1753 = vrsqrt.f32 %v1139_v56  ;;  %v1107_v59 = vmul.f32 0.03125, %v1013_v39 }
 0x278   :  { %1469 = vst.msk [vmem:[%s2995_s4 + $0x60] sm:$0xff] %vm481_vm0, %v1405_v6  ;;  %v1366_v14 = vmul.f32 %v2544_v23, %v1295_v61  ;;  %1755 = vrsqrt.f32 %v1174_v2  ;;  %v1076_v58 = vmul.f32 0.03125, %v920_v24 }
 0x279   :  { %v1746_v48 = vpop.eup %1745  ;;  %1504 = vst.msk [vmem:[%s2995_s4 + $0x178] sm:$0xff] %vm481_vm0, %v1440_v19  ;;  %v1335_v43 = vmul.f32 %v2544_v23, %v1264_v60  ;;  %v1171_v10 = vadd.f32 1e-05, %v1107_v59 }
 0x27a   :  { %v1748_v52 = vpop.eup %1747  ;;  %v1437_v1 = vadd.f32 %v2550_v27, %v1366_v14  ;;  %v1269_v38 = vmul.f32 %v1746_v48, %v2346_v17  ;;  %v1140_v62 = vadd.f32 1e-05, %v1076_v58  ;;  %v935_v44 = vpop.xlane.xlu0 %934 }
 0x27b   :  { %v1016_v41 = vpop.xlane.xlu1 %1015  ;;  %v1406_v63 = vadd.f32 %v2550_v27, %v1335_v43  ;;  %v1296_v42 = vmul.f32 %v1748_v52, %v2338_v40  ;;  %1757 = vrsqrt.f32 %v1171_v10  ;;  %v1081_v15 = vmul.f32 0.03125, %v935_v44 }
 0x27c   :  { %1501 = vst.msk [vmem:[%s2995_s4 + $0x160] sm:$0xff] %vm481_vm0, %v1437_v1  ;;  %v1340_v11 = vmul.f32 %v2544_v23, %v1269_v38  ;;  %1759 = vrsqrt.f32 %v1140_v62  ;;  %v1108_v7 = vmul.f32 0.03125, %v1016_v41 }
 0x27d   :  { %v1750_v57 = vpop.eup %1749  ;;  %1470 = vst.msk [vmem:[%s2995_s4 + $0x68] sm:$0xff] %vm481_vm0, %v1406_v63  ;;  %v1367_v17 = vmul.f32 %v2544_v23, %v1296_v42  ;;  %v1145_v40 = vadd.f32 1e-05, %v1081_v15 }
 0x27e   :  { %v1752_v13 = vpop.eup %1751  ;;  %v1411_v28 = vadd.f32 %v2550_v27, %v1340_v11  ;;  %v1301_v26 = vmul.f32 %v1750_v57, %v2359_v30  ;;  %v1172_v49 = vadd.f32 1e-05, %v1108_v7  ;;  %v1031_v53 = vpop.xlane.xlu0 %1030 }
 0x27f   :  { %v938_v8 = vpop.xlane.xlu1 %937  ;;  %v1438_v16 = vadd.f32 %v2550_v27, %v1367_v17  ;;  %v1270_v46 = vmul.f32 %v1752_v13, %v2349_v21  ;;  %1761 = vrsqrt.f32 %v1145_v40  ;;  %v1113_v4 = vmul.f32 0.03125, %v1031_v53 }
 0x280   :  { %1475 = vst.msk [vmem:[%s2995_s4 + $0x90] sm:$0xff] %vm481_vm0, %v1411_v28  ;;  %v1372_v36 = vmul.f32 %v2544_v23, %v1301_v26  ;;  %1763 = vrsqrt.f32 %v1172_v49  ;;  %v1082_v12 = vmul.f32 0.03125, %v938_v8 }
 0x281   :  { %v1754_v47 = vpop.eup %1753  ;;  %1502 = vst.msk [vmem:[%s2995_s4 + $0x168] sm:$0xff] %vm481_vm0, %v1438_v16  ;;  %v1341_v30 = vmul.f32 %v2544_v23, %v1270_v46  ;;  %v1177_v21 = vadd.f32 1e-05, %v1113_v4 }
 0x282   :  { %v1756_v5 = vpop.eup %1755  ;;  %v1443_v56 = vadd.f32 %v2550_v27, %v1372_v36  ;;  %v1267_v9 = vmul.f32 %v1754_v47, %v2370_v25  ;;  %v1146_v6 = vadd.f32 1e-05, %v1082_v12  ;;  %v929_v61 = vpop.xlane.xlu0 %928 }
 0x283   :  { %v1034_v2 = vpop.xlane.xlu1 %1033  ;;  %v1412_v39 = vadd.f32 %v2550_v27, %v1341_v30  ;;  %v1302_v24 = vmul.f32 %v1756_v5, %v2362_v35  ;;  %1765 = vrsqrt.f32 %v1177_v21  ;;  %v1079_v19 = vmul.f32 0.03125, %v929_v61 }
 0x284   :  { %1507 = vst.msk [vmem:[%s2995_s4 + $0x190] sm:$0xff] %vm481_vm0, %v1443_v56  ;;  %v1338_v34 = vmul.f32 %v2544_v23, %v1267_v9  ;;  %1767 = vrsqrt.f32 %v1146_v6  ;;  %v1114_v60 = vmul.f32 0.03125, %v1034_v2 }
 0x285   :  { %v1758_v59 = vpop.eup %1757  ;;  %1476 = vst.msk [vmem:[%s2995_s4 + $0x98] sm:$0xff] %vm481_vm0, %v1412_v39  ;;  %v1373_v25 = vmul.f32 %v2544_v23, %v1302_v24  ;;  %v1143_v35 = vadd.f32 1e-05, %v1079_v19 }
 0x286   :  { %v1760_v14 = vpop.eup %1759  ;;  %v1409_v58 = vadd.f32 %v2550_v27, %v1338_v34  ;;  %v1299_v48 = vmul.f32 %v1758_v59, %v2383_v32  ;;  %v1178_v43 = vadd.f32 1e-05, %v1114_v60  ;;  %v1025_v10 = vpop.xlane.xlu0 %1024 }
 0x287   :  { %v932_v52 = vpop.xlane.xlu1 %931  ;;  %v1444_v1 = vadd.f32 %v2550_v27, %v1373_v25  ;;  %v1268_v38 = vmul.f32 %v1760_v14, %v2373_v31  ;;  %1769 = vrsqrt.f32 %v1143_v35  ;;  %v1111_v62 = vmul.f32 0.03125, %v1025_v10 }
 0x288   :  { %1473 = vst.msk [vmem:[%s2995_s4 + $0x80] sm:$0xff] %vm481_vm0, %v1409_v58  ;;  %v1370_v44 = vmul.f32 %v2544_v23, %v1299_v48  ;;  %1771 = vrsqrt.f32 %v1178_v43  ;;  %v1080_v41 = vmul.f32 0.03125, %v932_v52 }
 0x289   :  { %v1762_v63 = vpop.eup %1761  ;;  %1508 = vst.msk [vmem:[%s2995_s4 + $0x198] sm:$0xff] %vm481_vm0, %v1444_v1  ;;  %v1339_v32 = vmul.f32 %v2544_v23, %v1268_v38  ;;  %v1175_v31 = vadd.f32 1e-05, %v1111_v62 }
 0x28a   :  { %v1764_v42 = vpop.eup %1763  ;;  %v1441_v15 = vadd.f32 %v2550_v27, %v1370_v44  ;;  %v1273_v11 = vmul.f32 %v1762_v63, %v2394_v29  ;;  %v1144_v7 = vadd.f32 1e-05, %v1080_v41  ;;  %v947_v57 = vpop.xlane.xlu0 %946 }
 0x28b   :  { %v1028_v17 = vpop.xlane.xlu1 %1027  ;;  %v1410_v40 = vadd.f32 %v2550_v27, %v1339_v32  ;;  %v1300_v13 = vmul.f32 %v1764_v42, %v2386_v18  ;;  %1773 = vrsqrt.f32 %v1175_v31  ;;  %v1085_v28 = vmul.f32 0.03125, %v947_v57 }
 0x28c   :  { %1505 = vst.msk [vmem:[%s2995_s4 + $0x180] sm:$0xff] %vm481_vm0, %v1441_v15  ;;  %v1344_v26 = vmul.f32 %v2544_v23, %v1273_v11  ;;  %1775 = vrsqrt.f32 %v1144_v7  ;;  %v1112_v49 = vmul.f32 0.03125, %v1028_v17 }
 0x28d   :  { %v1766_v53 = vpop.eup %1765  ;;  %1474 = vst.msk [vmem:[%s2995_s4 + $0x88] sm:$0xff] %vm481_vm0, %v1410_v40  ;;  %v1371_v29 = vmul.f32 %v2544_v23, %v1300_v13  ;;  %v1149_v18 = vadd.f32 1e-05, %v1085_v28 }
 0x28e   :  { %v1768_v8 = vpop.eup %1767  ;;  %v1415_v16 = vadd.f32 %v2550_v27, %v1344_v26  ;;  %v1305_v46 = vmul.f32 %v1766_v53, %v2407_v50  ;;  %v1176_v4 = vadd.f32 1e-05, %v1112_v49  ;;  %v1043_v36 = vpop.xlane.xlu0 %1042 }
 0x28f   :  { %v950_v12 = vpop.xlane.xlu1 %949  ;;  %v1442_v47 = vadd.f32 %v2550_v27, %v1371_v29  ;;  %v1274_v30 = vmul.f32 %v1768_v8, %v2397_v33  ;;  %1777 = vrsqrt.f32 %v1149_v18  ;;  %v1117_v21 = vmul.f32 0.03125, %v1043_v36 }
 0x290   :  { %1479 = vst.msk [vmem:[%s2995_s4 + $0xb0] sm:$0xff] %vm481_vm0, %v1415_v16  ;;  %v1376_v5 = vmul.f32 %v2544_v23, %v1305_v46  ;;  %1779 = vrsqrt.f32 %v1176_v4  ;;  %v1086_v56 = vmul.f32 0.03125, %v950_v12 }
 0x291   :  { %v1770_v9 = vpop.eup %1769  ;;  %1506 = vst.msk [vmem:[%s2995_s4 + $0x188] sm:$0xff] %vm481_vm0, %v1442_v47  ;;  %v1345_v50 = vmul.f32 %v2544_v23, %v1274_v30  ;;  %v1181_v33 = vadd.f32 1e-05, %v1117_v21 }
 0x292   :  { %v1772_v6 = vpop.eup %1771  ;;  %v1447_v61 = vadd.f32 %v2550_v27, %v1376_v5  ;;  %v1271_v2 = vmul.f32 %v1770_v9, %v2418_v37  ;;  %v1150_v39 = vadd.f32 1e-05, %v1086_v56  ;;  %v941_v24 = vpop.xlane.xlu0 %940 }
 0x293   :  { %v1046_v19 = vpop.xlane.xlu1 %1045  ;;  %v1416_v34 = vadd.f32 %v2550_v27, %v1345_v50  ;;  %v1306_v60 = vmul.f32 %v1772_v6, %v2410_v0  ;;  %1781 = vrsqrt.f32 %v1181_v33  ;;  %v1083_v59 = vmul.f32 0.03125, %v941_v24  ;;  %v3083_v33 = vld [vmem:[#allocation7_spill] sm:$0xff] }
 0x294   :  { %1511 = vst.msk [vmem:[%s2995_s4 + $0x1b0] sm:$0xff] %vm481_vm0, %v1447_v61  ;;  %v1342_v25 = vmul.f32 %v2544_v23, %v1271_v2  ;;  %1783 = vrsqrt.f32 %v1150_v39  ;;  %v1118_v35 = vmul.f32 0.03125, %v1046_v19 }
 0x295   :  { %v1774_v14 = vpop.eup %1773  ;;  %1480 = vst.msk [vmem:[%s2995_s4 + $0xb8] sm:$0xff] %vm481_vm0, %v1416_v34  ;;  %v1377_v37 = vmul.f32 %v2544_v23, %v1306_v60  ;;  %v1147_v0 = vadd.f32 1e-05, %v1083_v59  ;;  %v3084_v59 = vld [vmem:[#allocation22_spill] sm:$0xff] }
 0x296   :  { %v1776_v58 = vpop.eup %1775  ;;  %v1413_v48 = vadd.f32 %v2550_v27, %v1342_v25  ;;  %v1303_v43 = vmul.f32 %v1774_v14, %v2431_v54  ;;  %v1182_v10 = vadd.f32 1e-05, %v1118_v35  ;;  %v1037_v52 = vpop.xlane.xlu0 %1036 }
 0x297   :  { %v944_v1 = vpop.xlane.xlu1 %943  ;;  %v1448_v38 = vadd.f32 %v2550_v27, %v1377_v37  ;;  %v1272_v62 = vmul.f32 %v1776_v58, %v2421_v51  ;;  %1785 = vrsqrt.f32 %v1147_v0  ;;  %v1115_v44 = vmul.f32 0.03125, %v1037_v52  ;;  %v3085_v58 = vld [vmem:[#allocation10_spill] sm:$0xff] }
 0x298   :  { %1477 = vst.msk [vmem:[%s2995_s4 + $0xa0] sm:$0xff] %vm481_vm0, %v1413_v48  ;;  %v1374_v41 = vmul.f32 %v2544_v23, %v1303_v43  ;;  %1787 = vrsqrt.f32 %v1182_v10  ;;  %v1084_v63 = vmul.f32 0.03125, %v944_v1 }
 0x299   :  { %v1778_v32 = vpop.eup %1777  ;;  %1512 = vst.msk [vmem:[%s2995_s4 + $0x1b8] sm:$0xff] %vm481_vm0, %v1448_v38  ;;  %v1343_v54 = vmul.f32 %v2544_v23, %v1272_v62  ;;  %v1179_v51 = vadd.f32 1e-05, %v1115_v44 }
 0x29a   :  { %v1780_v31 = vpop.eup %1779  ;;  %v1445_v42 = vadd.f32 %v2550_v27, %v1374_v41  ;;  %v1277_v15 = vmul.f32 %v1778_v32, %v2442_v45  ;;  %v1148_v11 = vadd.f32 1e-05, %v1084_v63  ;;  %v959_v7 = vpop.xlane.xlu0 %958  ;;  %v3086_v63 = vld [vmem:[#allocation11_spill] sm:$0xff] }
 0x29b   :  { %v1040_v57 = vpop.xlane.xlu1 %1039  ;;  %v1414_v17 = vadd.f32 %v2550_v27, %v1343_v54  ;;  %v1304_v40 = vmul.f32 %v1780_v31, %v2434_v20  ;;  %1789 = vrsqrt.f32 %v1179_v51  ;;  %v1089_v13 = vmul.f32 0.03125, %v959_v7 }
 0x29c   :  { %1509 = vst.msk [vmem:[%s2995_s4 + $0x1a0] sm:$0xff] %vm481_vm0, %v1445_v42  ;;  %v1348_v28 = vmul.f32 %v2544_v23, %v1277_v15  ;;  %1791 = vrsqrt.f32 %v1148_v11  ;;  %v1116_v26 = vmul.f32 0.03125, %v1040_v57  ;;  %v3087_v15 = vld [vmem:[#allocation23_spill] sm:$0xff] }
 0x29d   :  { %v1782_v49 = vpop.eup %1781  ;;  %1478 = vst.msk [vmem:[%s2995_s4 + $0xa8] sm:$0xff] %vm481_vm0, %v1414_v17  ;;  %v1375_v45 = vmul.f32 %v2544_v23, %v1304_v40  ;;  %v1153_v20 = vadd.f32 1e-05, %v1089_v13 }
 0x29e   :  { %v1784_v53 = vpop.eup %1783  ;;  %v1419_v29 = vadd.f32 %v2550_v27, %v1348_v28  ;;  %v1309_v18 = vmul.f32 %v1782_v49, %v2455_v22  ;;  %v1180_v8 = vadd.f32 1e-05, %v1116_v26  ;;  %v3088_v49 = vld [vmem:[#allocation15_spill] sm:$0xff] }
 0x29f   :  { %v962_v16 = vpop.xlane.xlu1 %961  ;;  %v1446_v46 = vadd.f32 %v2550_v27, %v1375_v45  ;;  %v1278_v4 = vmul.f32 %v1784_v53, %v2445_v55  ;;  %1793 = vrsqrt.f32 %v1153_v20 }
 0x2a0   :  { %v1090_v36 = vmul.f32 0.03125, %v962_v16  ;;  %1483 = vst.msk [vmem:[%s2995_s4 + $0xd0] sm:$0xff] %vm481_vm0, %v1419_v29  ;;  %v1380_v12 = vmul.f32 %v2544_v23, %v1309_v18  ;;  %1795 = vrsqrt.f32 %v1180_v8  ;;  %v1811_v29 = vld [vmem:[%s2993_s2] ss:$0 sm:$0xff] }
 0x2a1   :  { %v1786_v47 = vpop.eup %1785  ;;  %1510 = vst.msk [vmem:[%s2995_s4 + $0x1a8] sm:$0xff] %vm481_vm0, %v1446_v46  ;;  %v1349_v22 = vmul.f32 %v2544_v23, %v1278_v4  ;;  %v3089_v46 = vld [vmem:[#allocation13_spill] sm:$0xff] }
 0x2a2   :  { %v1154_v30 = vadd.f32 1e-05, %v1090_v36  ;;  %v1788_v55 = vpop.eup %1787  ;;  %v1451_v21 = vadd.f32 %v2550_v27, %v1380_v12  ;;  %v1275_v5 = vmul.f32 %v1786_v47, %v2466_v3  ;;  %v953_v56 = vpop.xlane.xlu0 %952  ;;  %v3090_v36 = vld [vmem:[#allocation17_spill] sm:$0xff] }
 0x2a3   :  { %v956_v9 = vpop.xlane.xlu1 %955  ;;  %v1420_v50 = vadd.f32 %v2550_v27, %v1349_v22  ;;  %v1310_v6 = vmul.f32 %v1788_v55, %v3083_v33  ;;  %v1087_v61 = vmul.f32 0.03125, %v953_v56 }
 0x2a4   :  { %1797 = vrsqrt.f32 %v1154_v30  ;;  %1515 = vst.msk [vmem:[%s2995_s4 + $0x1d0] sm:$0xff] %vm481_vm0, %v1451_v21  ;;  %v1346_v2 = vmul.f32 %v2544_v23, %v1275_v5  ;;  %v1088_v39 = vmul.f32 0.03125, %v956_v9  ;;  %v3091_v5 = vld [vmem:[#allocation14_spill] sm:$0xff] }
 0x2a5   :  { %v1790_v24 = vpop.eup %1789  ;;  %1484 = vst.msk [vmem:[%s2995_s4 + $0xd8] sm:$0xff] %vm481_vm0, %v1420_v50  ;;  %v1381_v3 = vmul.f32 %v2544_v23, %v1310_v6  ;;  %v1151_v19 = vadd.f32 1e-05, %v1087_v61  ;;  %v3092_v50 = vld [vmem:[#allocation24_spill] sm:$0xff] }
 0x2a6   :  { %v1792_v34 = vpop.eup %1791  ;;  %v1417_v60 = vadd.f32 %v2550_v27, %v1346_v2  ;;  %v1307_v25 = vmul.f32 %v1790_v24, %v3084_v59  ;;  %v1152_v35 = vadd.f32 1e-05, %v1088_v39  ;;  %v1049_v14 = vpop.xlane.xlu0 %1048 }
 0x2a7   :  { %v1052_v37 = vpop.xlane.xlu1 %1051  ;;  %v1452_v0 = vadd.f32 %v2550_v27, %v1381_v3  ;;  %v1276_v48 = vmul.f32 %v1792_v34, %v3085_v58  ;;  %1799 = vrsqrt.f32 %v1151_v19  ;;  %v1119_v43 = vmul.f32 0.03125, %v1049_v14  ;;  %v3093_v3 = vld [vmem:[#allocation12_spill] sm:$0xff] }
 0x2a8   :  { %1481 = vst.msk [vmem:[%s2995_s4 + $0xc0] sm:$0xff] %vm481_vm0, %v1417_v60  ;;  %v1378_v10 = vmul.f32 %v2544_v23, %v1307_v25  ;;  %1801 = vrsqrt.f32 %v1152_v35  ;;  %v1120_v52 = vmul.f32 0.03125, %v1052_v37  ;;  %v3094_v60 = vld [vmem:[#allocation16_spill] sm:$0xff] }
 0x2a9   :  { %v1794_v1 = vpop.eup %1793  ;;  %1516 = vst.msk [vmem:[%s2995_s4 + $0x1d8] sm:$0xff] %vm481_vm0, %v1452_v0  ;;  %v1347_v38 = vmul.f32 %v2544_v23, %v1276_v48  ;;  %v1183_v62 = vadd.f32 1e-05, %v1119_v43 }
 0x2aa   :  { %v1796_v44 = vpop.eup %1795  ;;  %v1449_v41 = vadd.f32 %v2550_v27, %v1378_v10  ;;  %v1281_v32 = vmul.f32 %v1794_v1, %v3086_v63  ;;  %v1184_v54 = vadd.f32 1e-05, %v1120_v52  ;;  %v1055_v51 = vpop.xlane.xlu0 %1054 }
 0x2ab   :  { %v1058_v31 = vpop.xlane.xlu1 %1057  ;;  %v1418_v42 = vadd.f32 %v2550_v27, %v1347_v38  ;;  %v1308_v11 = vmul.f32 %v1796_v44, %v3087_v15  ;;  %1803 = vrsqrt.f32 %v1183_v62  ;;  %v1121_v7 = vmul.f32 0.03125, %v1055_v51 }
 0x2ac   :  { %1513 = vst.msk [vmem:[%s2995_s4 + $0x1c0] sm:$0xff] %vm481_vm0, %v1449_v41  ;;  %v1352_v57 = vmul.f32 %v2544_v23, %v1281_v32  ;;  %1805 = vrsqrt.f32 %v1184_v54  ;;  %v1122_v17 = vmul.f32 0.03125, %v1058_v31 }
 0x2ad   :  { %1482 = vst.msk [vmem:[%s2995_s4 + $0xc8] sm:$0xff] %vm481_vm0, %v1418_v42  ;;  %v1379_v13 = vmul.f32 %v2544_v23, %v1308_v11  ;;  %v1185_v28 = vadd.f32 1e-05, %v1121_v7 }
 0x2ae   :  { %v1798_v40 = vpop.eup %1797  ;;  %v1423_v26 = vadd.f32 %v2550_v27, %v1352_v57  ;;  %v1186_v20 = vadd.f32 1e-05, %v1122_v17 }
 0x2af   :  { %v1282_v45 = vmul.f32 %v1798_v40, %v3088_v49  ;;  %v1450_v53 = vadd.f32 %v2550_v27, %v1379_v13  ;;  %1807 = vrsqrt.f32 %v1185_v28  ;;  %v1812_v27 = vld [vmem:[%s2994_s3] ss:$0 sm:$0xff] }
 0x2b0   :  { %1487 = vst.msk [vmem:[%s2995_s4 + $0xf0] sm:$0xff] %vm481_vm0, %v1423_v26  ;;  %1809 = vrsqrt.f32 %v1186_v20 }
 0x2b1   :  { %v1353_v18 = vmul.f32 %v1811_v29, %v1282_v45  ;;  %v1800_v23 = vpop.eup %1799  ;;  %1514 = vst.msk [vmem:[%s2995_s4 + $0x1c8] sm:$0xff] %vm481_vm0, %v1450_v53 }
 0x2b2   :  { %v1802_v8 = vpop.eup %1801  ;;  %v1279_v4 = vmul.f32 %v1800_v23, %v3089_v46 }
 0x2b3   :  { %v1424_v16 = vadd.f32 %v1812_v27, %v1353_v18  ;;  %v1280_v12 = vmul.f32 %v1802_v8, %v3090_v36 }
 0x2b4   :  { %v1350_v47 = vmul.f32 %v1811_v29, %v1279_v4 }
 0x2b5   :  { %1488 = vst.msk [vmem:[%s2995_s4 + $0xf8] sm:$0xff] %vm481_vm0, %v1424_v16  ;;  %v1804_v22 = vpop.eup %1803  ;;  %v1351_v30 = vmul.f32 %v1811_v29, %v1280_v12 }
 0x2b6   :  { %v1806_v55 = vpop.eup %1805  ;;  %v1421_v21 = vadd.f32 %v1812_v27, %v1350_v47  ;;  %v1311_v56 = vmul.f32 %v1804_v22, %v3091_v5 }
 0x2b7   :  { %v1422_v9 = vadd.f32 %v1812_v27, %v1351_v30  ;;  %v1312_v33 = vmul.f32 %v1806_v55, %v3092_v50 }
 0x2b8   :  { %1485 = vst.msk [vmem:[%s2995_s4 + $0xe0] sm:$0xff] %vm481_vm0, %v1421_v21  ;;  %v1382_v6 = vmul.f32 %v1811_v29, %v1311_v56 }
 0x2b9   :  { %v1808_v61 = vpop.eup %1807  ;;  %1486 = vst.msk [vmem:[%s2995_s4 + $0xe8] sm:$0xff] %vm481_vm0, %v1422_v9  ;;  %v1383_v2 = vmul.f32 %v1811_v29, %v1312_v33 }
 0x2ba   :  { %v1810_v39 = vpop.eup %1809  ;;  %v1453_v24 = vadd.f32 %v1812_v27, %v1382_v6  ;;  %v1313_v19 = vmul.f32 %v1808_v61, %v3093_v3 }
 0x2bb   :  { %v1454_v34 = vadd.f32 %v1812_v27, %v1383_v2  ;;  %v1314_v59 = vmul.f32 %v1810_v39, %v3094_v60 }
 0x2bc   :  { %1517 = vst.msk [vmem:[%s2995_s4 + $0x1e0] sm:$0xff] %vm481_vm0, %v1453_v24  ;;  %v1384_v25 = vmul.f32 %v1811_v29, %v1313_v19 }
 0x2bd   :  { %1518 = vst.msk [vmem:[%s2995_s4 + $0x1e8] sm:$0xff] %vm481_vm0, %v1454_v34  ;;  %v1385_v35 = vmul.f32 %v1811_v29, %v1314_v59 }
 0x2be   :  { %v1455_v14 = vadd.f32 %v1812_v27, %v1384_v25 }
 0x2bf   :  { %v1456_v37 = vadd.f32 %v1812_v27, %v1385_v35 }
 0x2c0   :  { %1519 = vst.msk [vmem:[%s2995_s4 + $0x1f0] sm:$0xff] %vm481_vm0, %v1455_v14 }
 0x2c1   :  { %1520 = vst.msk [vmem:[%s2995_s4 + $0x1f8] sm:$0xff] %vm481_vm0, %v1456_v37 }
 0x2c2   :  { %1525 = vsyncpa [#allocation3], 1 }

</bundles_post_ra>
